<compile_context>
chip_gen: v6e
topology: v6e:2x2x1
jax: 0.10.0
libtpu: 0.0.40
codegen_flags: <defaults>
</compile_context>

<pallas_src>
import jax
import jax.numpy as jnp
import numpy as np
from jax.experimental import pallas as pl
from jax.experimental.pallas import tpu as pltpu

TEXT_DIM = 768       # DistilBERT hidden size
IMAGE_DIM = 1280     # EfficientNetV2-M pooled feature size
HIDDEN_DIM = 512     # MHCA hidden_dim
NUM_HEADS = 4
HEAD_DIM = HIDDEN_DIM // NUM_HEADS   # 128
OUTPUT_DIM = 2048    # MHCA output_dim
PROJ_DIM = 768       # image_projection output
COMBINED_DIM = OUTPUT_DIM + PROJ_DIM  # 2816
CLS_HIDDEN = 512     # classifier hidden


# ----------------------------------------------------------------------------- kernel
def _mm_head_kernel(text_ref, img_ref,
                    w_text_ref, w_img_ref, b1_ref,
                    w2_ref, b2_ref,
                    out_ref):
    f32 = jnp.float32
    # Folded affine map.  The module's cross-attention is over a length-1 key axis,
    # so softmax == 1.0 and the attention output is exactly V; the whole
    # MHCA-out_proj / image_projection / classifier[0] chain is folded offline into
    # w_text_ref / w_img_ref / b1_ref (see fold_params).  bf16 operands, f32 MXU acc.
    h = jnp.dot(text_ref[...], w_text_ref[...], preferred_element_type=f32)   # [TB, 512]
    h = h + jnp.dot(img_ref[...], w_img_ref[...], preferred_element_type=f32) # [TB, 512]
    h = jnp.maximum(h + b1_ref[...], 0.0)        # ReLU; Dropout(0.2) is identity at inference
    logits = (jnp.dot(h.astype(jnp.bfloat16), w2_ref[...], preferred_element_type=f32)
              + b2_ref[...])                                                   # [TB, Lpad]
    out_ref[...] = logits.astype(out_ref.dtype)


# ----------------------------------------------------------------------- weight folding
def fold_params(p, num_labels):
    """Fold the purely-linear MHCA/out_proj/image_projection/classifier[0] chain."""
    hp = jax.lax.Precision.HIGHEST
    l_pad = max(128, pl.cdiv(num_labels, 128) * 128)

    w1 = p["w1"]                                       # [2816, 512]
    w1a, w1b = w1[:OUTPUT_DIM], w1[OUTPUT_DIM:]        # text-half / image-half of classifier[0]

    # attended_text = (img  @ w_iv) @ w_out                       -> contributes via w1a
    # attended_img  = ((text @ w_tv) @ w_out) @ w_proj + b_proj   -> contributes via w1b
    w_img_fold = jnp.dot(jnp.dot(p["w_iv"], p["w_out"], precision=hp), w1a, precision=hp)   # [1280, 512]
    w_text_fold = jnp.dot(
        jnp.dot(jnp.dot(p["w_tv"], p["w_out"], precision=hp), p["w_proj"], precision=hp),
        w1b, precision=hp)                                                                   # [768, 512]
    b_fold = jnp.dot(p["b_proj"], w1b, precision=hp) + p["b1"]                               # [512]

    # Pad the final classifier to a lane-dense 128-multiple output width.
    w2_p = jnp.zeros((CLS_HIDDEN, l_pad), jnp.float32).at[:, :num_labels].set(p["w2"])
    b2_p = jnp.zeros((1, l_pad), jnp.float32).at[:, :num_labels].set(p["b2"].reshape(1, -1))

    return {
        "w_text": w_text_fold.astype(jnp.bfloat16),
        "w_img": w_img_fold.astype(jnp.bfloat16),
        "b1": b_fold.reshape(1, -1).astype(jnp.float32),
        "w2": w2_p.astype(jnp.bfloat16),
        "b2": b2_p,
        "l_pad": int(l_pad),
    }


# ---------------------------------------------------------------------------- wrapper
def multimodal_head(text_features, image_features, folded, num_labels, *, batch_tile=None):
    """text_features: [B, 768], image_features: [B, 1280] -> logits [B, num_labels]."""
    B = text_features.shape[0]
    l_pad = folded["l_pad"]

    if batch_tile is None:
        if B >= 256:
            batch_tile = 256            # saturate MXU M dim on v6e/v7x
        elif B >= 128:
            batch_tile = 128            # v5e MXU tile
        else:
            batch_tile = max(16, pl.cdiv(B, 16) * 16)   # tiny-batch latency; bf16 sublane-friendly
    b_pad = pl.cdiv(B, batch_tile) * batch_tile

    text_p = jnp.zeros((b_pad, TEXT_DIM), jnp.bfloat16).at[:B].set(
        text_features.astype(jnp.bfloat16))
    img_p = jnp.zeros((b_pad, IMAGE_DIM), jnp.bfloat16).at[:B].set(
        image_features.astype(jnp.bfloat16))

    batch_spec = lambda d: pl.BlockSpec((batch_tile, d), lambda b: (b, 0))
    full_spec = lambda r, c: pl.BlockSpec((r, c), lambda b: (0, 0))

    # VMEM budget derived from the actual footprint (double-buffered), clamped well
    # below v7x's 64 MiB physical VMEM per TensorCore.
    weight_bytes = (2 * (TEXT_DIM * CLS_HIDDEN + IMAGE_DIM * CLS_HIDDEN + CLS_HIDDEN * l_pad)
                    + 4 * (CLS_HIDDEN + l_pad))
    act_bytes = batch_tile * (2 * TEXT_DIM + 2 * IMAGE_DIM + 4 * l_pad + 4 * CLS_HIDDEN)
    vmem_limit = int(min(max(2 * (weight_bytes + act_bytes) + (8 << 20), 16 << 20), 48 << 20))

    out = pl.pallas_call(
        _mm_head_kernel,
        out_shape=jax.ShapeDtypeStruct((b_pad, l_pad), jnp.float32),
        grid_spec=pltpu.PrefetchScalarGridSpec(
            num_scalar_prefetch=0,
            grid=(b_pad // batch_tile,),
            in_specs=[
                batch_spec(TEXT_DIM),                 # text features (bf16)
                batch_spec(IMAGE_DIM),                # image features (bf16)
                full_spec(TEXT_DIM, CLS_HIDDEN),      # W_text_fold (bf16)
                full_spec(IMAGE_DIM, CLS_HIDDEN),     # W_img_fold (bf16)
                full_spec(1, CLS_HIDDEN),             # folded bias (f32)
                full_spec(CLS_HIDDEN, l_pad),         # W2 padded (bf16)
                full_spec(1, l_pad),                  # b2 padded (f32)
            ],
            out_specs=batch_spec(l_pad),
        ),
        compiler_params=pltpu.CompilerParams(
            dimension_semantics=("parallel",),
            vmem_limit_bytes=vmem_limit,
        ),
    )(text_p, img_p,
      folded["w_text"], folded["w_img"], folded["b1"],
      folded["w2"], folded["b2"])

    return out[:B, :num_labels]


# ------------------------------------------------------------------------- parameters
def init_params(key, num_labels):
    ks = jax.random.split(key, 16)

    def w(k, fan_in, fan_out):
        return jax.random.normal(k, (fan_in, fan_out), jnp.float32) / jnp.sqrt(float(fan_in))

    def b(k, fan_in, fan_out):
        return jax.random.normal(k, (fan_out,), jnp.float32) / jnp.sqrt(float(fan_in))

    return {
        # MHCA (bias=False).  Q/K weights are only used by the pure-JAX reference;
        # they provably do not affect the output (softmax over a length-1 key axis == 1).
        "w_tq": w(ks[0], TEXT_DIM, HIDDEN_DIM),
        "w_tk": w(ks[1], TEXT_DIM, HIDDEN_DIM),
        "w_tv": w(ks[2], TEXT_DIM, HIDDEN_DIM),
        "w_iq": w(ks[3], IMAGE_DIM, HIDDEN_DIM),
        "w_ik": w(ks[4], IMAGE_DIM, HIDDEN_DIM),
        "w_iv": w(ks[5], IMAGE_DIM, HIDDEN_DIM),
        "w_out": w(ks[6], HIDDEN_DIM, OUTPUT_DIM),
        # image_projection: Linear(2048, 768) (created in forward; init'd deterministically here)
        "w_proj": w(ks[7], OUTPUT_DIM, PROJ_DIM),
        "b_proj": b(ks[8], OUTPUT_DIM, PROJ_DIM),
        # classifier: Linear(2816, 512) -> ReLU -> Dropout -> Linear(512, num_labels)
        "w1": w(ks[9], COMBINED_DIM, CLS_HIDDEN),
        "b1": b(ks[10], COMBINED_DIM, CLS_HIDDEN),
        "w2": w(ks[11], CLS_HIDDEN, num_labels),
        "b2": b(ks[12], CLS_HIDDEN, num_labels),
    }


# -------------------------------------------------------------------- pure-JAX reference
def reference_forward(text_features, image_features, p, num_labels):
    """Un-folded f32 reference of the full module forward (including Q/K/softmax)."""
    hp = jax.lax.Precision.HIGHEST
    tf = text_features[:, None, :]    # [B, 1, 768]
    imf = image_features[:, None, :]  # [B, 1, 1280]
    B = tf.shape[0]

    def lin(x, wmat):
        return jnp.einsum("bsd,dh->bsh", x, wmat, precision=hp)

    q_t, k_t, v_t = lin(tf, p["w_tq"]), lin(tf, p["w_tk"]), lin(tf, p["w_tv"])
    q_i, k_i, v_i = lin(imf, p["w_iq"]), lin(imf, p["w_ik"]), lin(imf, p["w_iv"])

    def heads(x):
        return x.reshape(B, -1, NUM_HEADS, HEAD_DIM).transpose(0, 2, 1, 3)

    q_t, k_t, v_t, q_i, k_i, v_i = map(heads, (q_t, k_t, v_t, q_i, k_i, v_i))
    scale = 1.0 / (HEAD_DIM ** 0.5)
    s_ti = jnp.einsum("bhqd,bhkd->bhqk", q_t, k_i, precision=hp) * scale
    s_it = jnp.einsum("bhqd,bhkd->bhqk", q_i, k_t, precision=hp) * scale
    p_ti = jax.nn.softmax(s_ti, axis=-1)
    p_it = jax.nn.softmax(s_it, axis=-1)
    o_ti = jnp.einsum("bhqk,bhkd->bhqd", p_ti, v_i, precision=hp).transpose(0, 2, 1, 3).reshape(B, -1)
    o_it = jnp.einsum("bhqk,bhkd->bhqd", p_it, v_t, precision=hp).transpose(0, 2, 1, 3).reshape(B, -1)

    attended_text = jnp.dot(o_ti, p["w_out"], precision=hp)
    attended_image = jnp.dot(o_it, p["w_out"], precision=hp)
    attended_image = jnp.dot(attended_image, p["w_proj"], precision=hp) + p["b_proj"]
    combined = jnp.concatenate([attended_text, attended_image], axis=-1)
    h = jnp.maximum(jnp.dot(combined, p["w1"], precision=hp) + p["b1"], 0.0)
    return jnp.dot(h, p["w2"], precision=hp) + p["b2"]


# ---------------------------------------------------------------------------------- main
if __name__ == "__main__":
    key = jax.random.PRNGKey(0)
    k_text, k_img, k_param = jax.random.split(key, 3)

    B = 2
    NUM_LABELS = 10

    # Backbone outputs (see TODO(synk) at top of file).
    text_features = jax.random.normal(k_text, (B, TEXT_DIM), jnp.float32)
    image_features = jax.random.normal(k_img, (B, IMAGE_DIM), jnp.float32)
    params = init_params(k_param, NUM_LABELS)
    folded = fold_params(params, NUM_LABELS)

    logits = multimodal_head(text_features, image_features, folded, NUM_LABELS)
    logits = jax.block_until_ready(logits)
    assert logits.shape == (B, NUM_LABELS), logits.shape

    ref = reference_forward(text_features, image_features, params, NUM_LABELS)
    # bf16 weights/activations + folded f32 rounding order introduce ~1e-2-level error
    # relative to the f32 HIGHEST-precision reference.
    np.testing.assert_allclose(np.asarray(logits), np.asarray(ref), rtol=3e-2, atol=3e-2)

    print("KERNEL_OK")
</pallas_src>

<mosaic_0001>
module attributes {stable_mosaic.version = 11 : i64} {
  func.func @_mm_head_kernel(%arg0: i32, %arg1: memref<16x768xbf16, #tpu.memory_space<vmem>>, %arg2: memref<16x1280xbf16, #tpu.memory_space<vmem>>, %arg3: memref<768x512xbf16, #tpu.memory_space<vmem>>, %arg4: memref<1280x512xbf16, #tpu.memory_space<vmem>>, %arg5: memref<1x512xf32, #tpu.memory_space<vmem>>, %arg6: memref<512x128xbf16, #tpu.memory_space<vmem>>, %arg7: memref<1x128xf32, #tpu.memory_space<vmem>>, %arg8: memref<16x128xf32, #tpu.memory_space<vmem>>) attributes {dimension_semantics = [#tpu.dimension_semantics<parallel>], iteration_bounds = array<i64: 1>, scalar_prefetch = 0 : i64, scratch_operands = 0 : i64, tpu.core_type = #tpu.core_type<tc>, window_params = [{transform_indices = @transform_0, window_bounds = array<i64: 16, 768>}, {transform_indices = @transform_1, window_bounds = array<i64: 16, 1280>}, {pipeline_mode = #tpu.pipeline_mode<synchronous>, transform_indices = @transform_2, window_bounds = array<i64: 768, 512>}, {pipeline_mode = #tpu.pipeline_mode<synchronous>, transform_indices = @transform_3, window_bounds = array<i64: 1280, 512>}, {pipeline_mode = #tpu.pipeline_mode<synchronous>, transform_indices = @transform_4, window_bounds = array<i64: 1, 512>}, {pipeline_mode = #tpu.pipeline_mode<synchronous>, transform_indices = @transform_5, window_bounds = array<i64: 512, 128>}, {pipeline_mode = #tpu.pipeline_mode<synchronous>, transform_indices = @transform_6, window_bounds = array<i64: 1, 128>}, {transform_indices = @transform_7, window_bounds = array<i64: 16, 128>}]} {
    %c0 = arith.constant 0 : index
    %c0_0 = arith.constant 0 : index
    %0 = vector.load %arg1[%c0, %c0_0] : memref<16x768xbf16, #tpu.memory_space<vmem>>, vector<16x768xbf16>
    %c0_1 = arith.constant 0 : index
    %c0_2 = arith.constant 0 : index
    %1 = vector.load %arg3[%c0_1, %c0_2] : memref<768x512xbf16, #tpu.memory_space<vmem>>, vector<768x512xbf16>
    %cst = arith.constant dense<0.000000e+00> : vector<16x512xf32>
    %2 = tpu.matmul %0, %1, %cst {dimension_numbers = #tpu.dot_dimension_numbers<[1], [0], [0], [1], [0, 0, 1, 1], [], []>} : vector<16x768xbf16>, vector<768x512xbf16>, vector<16x512xf32> -> vector<16x512xf32>
    %c0_3 = arith.constant 0 : index
    %c0_4 = arith.constant 0 : index
    %3 = vector.load %arg2[%c0_3, %c0_4] : memref<16x1280xbf16, #tpu.memory_space<vmem>>, vector<16x1280xbf16>
    %c0_5 = arith.constant 0 : index
    %c0_6 = arith.constant 0 : index
    %4 = vector.load %arg4[%c0_5, %c0_6] : memref<1280x512xbf16, #tpu.memory_space<vmem>>, vector<1280x512xbf16>
    %cst_7 = arith.constant dense<0.000000e+00> : vector<16x512xf32>
    %5 = tpu.matmul %3, %4, %cst_7 {dimension_numbers = #tpu.dot_dimension_numbers<[1], [0], [0], [1], [0, 0, 1, 1], [], []>} : vector<16x1280xbf16>, vector<1280x512xbf16>, vector<16x512xf32> -> vector<16x512xf32>
    %6 = arith.addf %2, %5 : vector<16x512xf32>
    %c0_8 = arith.constant 0 : index
    %c0_9 = arith.constant 0 : index
    %7 = vector.load %arg5[%c0_8, %c0_9] : memref<1x512xf32, #tpu.memory_space<vmem>>, vector<1x512xf32>
    %8 = vector.broadcast %7 : vector<1x512xf32> to vector<16x512xf32>
    %9 = arith.addf %6, %8 : vector<16x512xf32>
    %cst_10 = arith.constant 0.000000e+00 : f32
    %10 = vector.broadcast %cst_10 : f32 to vector<16x512xf32>
    %11 = arith.maximumf %9, %10 : vector<16x512xf32>
    %12 = arith.truncf %11 : vector<16x512xf32> to vector<16x512xbf16>
    %c0_11 = arith.constant 0 : index
    %c0_12 = arith.constant 0 : index
    %13 = vector.load %arg6[%c0_11, %c0_12] : memref<512x128xbf16, #tpu.memory_space<vmem>>, vector<512x128xbf16>
    %cst_13 = arith.constant dense<0.000000e+00> : vector<16x128xf32>
    %14 = tpu.matmul %12, %13, %cst_13 {dimension_numbers = #tpu.dot_dimension_numbers<[1], [0], [0], [1], [0, 0, 1, 1], [], []>} : vector<16x512xbf16>, vector<512x128xbf16>, vector<16x128xf32> -> vector<16x128xf32>
    %c0_14 = arith.constant 0 : index
    %c0_15 = arith.constant 0 : index
    %15 = vector.load %arg7[%c0_14, %c0_15] : memref<1x128xf32, #tpu.memory_space<vmem>>, vector<1x128xf32>
    %16 = vector.broadcast %15 : vector<1x128xf32> to vector<16x128xf32>
    %17 = arith.addf %14, %16 : vector<16x128xf32>
    %c0_16 = arith.constant 0 : index
    %c0_17 = arith.constant 0 : index
    %18 = vector.load %arg8[%c0_16, %c0_17] : memref<16x128xf32, #tpu.memory_space<vmem>>, vector<16x128xf32>
    tpu.vector_store %arg8[%c0_16, %c0_17], %17 {strides = array<i32>} : memref<16x128xf32, #tpu.memory_space<vmem>>, vector<16x128xf32>,
    return
  }
  func.func @transform_0(%arg0: i32) -> (i32, i32) {
    %c0_i32 = arith.constant 0 : i32
    %c0_i32_0 = arith.constant 0 : i32
    return %arg0, %c0_i32 : i32, i32
  }
  func.func @transform_1(%arg0: i32) -> (i32, i32) {
    %c0_i32 = arith.constant 0 : i32
    %c0_i32_0 = arith.constant 0 : i32
    return %arg0, %c0_i32 : i32, i32
  }
  func.func @transform_2(%arg0: i32) -> (i32, i32) {
    %c0_i32 = arith.constant 0 : i32
    %c0_i32_0 = arith.constant 0 : i32
    %c0_i32_1 = arith.constant 0 : i32
    return %c0_i32, %c0_i32_0 : i32, i32
  }
  func.func @transform_3(%arg0: i32) -> (i32, i32) {
    %c0_i32 = arith.constant 0 : i32
    %c0_i32_0 = arith.constant 0 : i32
    %c0_i32_1 = arith.constant 0 : i32
    return %c0_i32, %c0_i32_0 : i32, i32
  }
  func.func @transform_4(%arg0: i32) -> (i32, i32) {
    %c0_i32 = arith.constant 0 : i32
    %c0_i32_0 = arith.constant 0 : i32
    %c0_i32_1 = arith.constant 0 : i32
    return %c0_i32, %c0_i32_0 : i32, i32
  }
  func.func @transform_5(%arg0: i32) -> (i32, i32) {
    %c0_i32 = arith.constant 0 : i32
    %c0_i32_0 = arith.constant 0 : i32
    %c0_i32_1 = arith.constant 0 : i32
    return %c0_i32, %c0_i32_0 : i32, i32
  }
  func.func @transform_6(%arg0: i32) -> (i32, i32) {
    %c0_i32 = arith.constant 0 : i32
    %c0_i32_0 = arith.constant 0 : i32
    %c0_i32_1 = arith.constant 0 : i32
    return %c0_i32, %c0_i32_0 : i32, i32
  }
  func.func @transform_7(%arg0: i32) -> (i32, i32) {
    %c0_i32 = arith.constant 0 : i32
    %c0_i32_0 = arith.constant 0 : i32
    return %arg0, %c0_i32 : i32, i32
  }
}

</mosaic_0001>

<bundles_post_ra>
// kernel: tpu_custom_call.1
= control target key start
LH: loop header
LB: loop body
LE: loop exit
PB: predicated region body
PF: predicated region fallthrough
CT: control target
= control target key end

     0   :  { %12 = vsyncpa [#allocation3], 0  ;;  %s6225_s0 = inlined_call_operand.hbm [shape: bf16[16,768], index: 0, kind: input, shape index: {}]   ;;  %s6226_s1 = inlined_call_operand.hbm [shape: bf16[16,1280], index: 1, kind: input, shape index: {}]   ;;  %s6227_s2 = inlined_call_operand.hbm [shape: bf16[768,512], index: 2, kind: input, shape index: {}]   ;;  %s6228_s3 = inlined_call_operand.hbm [shape: bf16[1280,512], index: 3, kind: input, shape index: {}]   ;;  %s6229_s4 = inlined_call_operand.hbm [shape: f32[1,512], index: 4, kind: input, shape index: {}]   ;;  %s6230_s5 = inlined_call_operand.hbm [shape: bf16[512,128], index: 5, kind: input, shape index: {}]   ;;  %s6231_s6 = inlined_call_operand.hbm [shape: f32[1,128], index: 6, kind: input, shape index: {}]   ;;  %s6232_s7 = inlined_call_operand.hbm [shape: f32[16,128], index: 7, kind: output, shape index: {}]  }
   0x1   :  { %13 = vsyncpa [#allocation6], 0 }
   0x2   :  { %14 = vsyncpa [#allocation9], 0 }
   0x3   :  { %15 = vsyncpa [#allocation12], 0 }
   0x4   :  { %16 = vsyncpa [#allocation4], 0  ;;  %s6005_s24 = smov [#allocation5]  }
   0x5   :  { %s34_s25 = sshll.u32 %s6005_s24, 4  ;;  %s35_s25 = int_to_ptr.vmem [resolvable:$true] %s34_s25 }
   0x6   :  { %s5843_s26 = scalar_lea.vmem %s35_s25, 1280  ;;  %p5848_p1 = scmp.lt.s32.totalorder %s35_s25, %s35_s25 }
   0x7   :  { %p5844_p0 = scmp.ne.s32.totalorder %s35_s25, %s5843_s26  ;;  %p5849_p2 = scmp.lt.s32.totalorder %s5843_s26, %s5843_s26 }
   0x9   :  { %p5850_p3 = por %p5849_p2, %p5848_p1 }
   0xb   :  { %p5851_p4 = pnand %p5850_p3, %p5844_p0 }
   0xd   :  { %5854 = shalt.err (!%p5851_p4)
}
   0xe   :  { %s6006_s27 = smov 640   ;;  %s6007_s28 = smov 40  }
   0xf   :  { %40 = dma.hbm_to_vmem [thread:$0]  %s6226_s1, 1280, %s35_s25, [#allocation6], %s6006_s27, %s6006_s27, %s6007_s28  }
  0x10   :  { %s6008_s8 = smov [#allocation8]   ;;  %s6009_s10 = smov [#allocation11]  }
  0x11   :  { %s58_s9 = sshll.u32 %s6008_s8, 4  ;;  %s80_s11 = sshll.u32 %s6009_s10, 4  ;;  %s59_s9 = int_to_ptr.vmem [resolvable:$true] %s58_s9  ;;  %s81_s11 = int_to_ptr.vmem [resolvable:$true] %s80_s11 }
  0x12   :  { %s5863_s12 = scalar_lea.vmem %s59_s9, 40960  ;;  %p5868_p6 = scmp.lt.s32.totalorder %s59_s9, %s59_s9 }
  0x13   :  { %p5864_p5 = scmp.ne.s32.totalorder %s59_s9, %s5863_s12  ;;  %p5869_p7 = scmp.lt.s32.totalorder %s5863_s12, %s5863_s12 }
  0x15   :  { %p5870_p8 = por %p5869_p7, %p5868_p6 }
  0x17   :  { %p5871_p9 = pnand %p5870_p8, %p5864_p5 }
  0x19   :  { %5874 = shalt.err (!%p5871_p9)
}
  0x1a   :  { %s6010_s13 = smov 256   ;;  %s6011_s14 = smov 16  }
  0x1b   :  { %64 = dma.hbm_to_vmem [thread:$0]  %s6228_s3, 40960, %s59_s9, [#allocation9], %s6010_s13, %s6010_s13, %s6011_s14  }
  0x1c   :  { %s5883_s1 = scalar_lea.vmem %s81_s11, 4096  ;;  %p5888_p11 = scmp.lt.s32.totalorder %s81_s11, %s81_s11 }
  0x1d   :  { %p5884_p10 = scmp.ne.s32.totalorder %s81_s11, %s5883_s1  ;;  %p5889_p12 = scmp.lt.s32.totalorder %s5883_s1, %s5883_s1 }
  0x1f   :  { %p5890_p13 = por %p5889_p12, %p5888_p11 }
  0x21   :  { %p5891_p0 = pnand %p5890_p13, %p5884_p10 }
  0x23   :  { %5894 = shalt.err (!%p5891_p0)
}
  0x24   :  { %s6012_s17 = smov 64   ;;  %s6013_s18 = smov 4  }
  0x25   :  { %86 = dma.hbm_to_vmem [thread:$0]  %s6230_s5, 4096, %s81_s11, [#allocation12], %s6012_s17, %s6012_s17, %s6013_s18  }
  0x26   :  { %s6014_s21 = smov [#allocation2]  }
  0x27   :  { %s22_s22 = sshll.u32 %s6014_s21, 4  ;;  %s23_s22 = int_to_ptr.vmem [resolvable:$true] %s22_s22 }
  0x28   :  { %s5903_s23 = scalar_lea.vmem %s23_s22, 768  ;;  %p5908_p2 = scmp.lt.s32.totalorder %s23_s22, %s23_s22 }
  0x29   :  { %p5904_p1 = scmp.ne.s32.totalorder %s23_s22, %s5903_s23  ;;  %p5909_p3 = scmp.lt.s32.totalorder %s5903_s23, %s5903_s23 }
  0x2b   :  { %p5910_p4 = por %p5909_p3, %p5908_p2 }
  0x2d   :  { %p5911_p5 = pnand %p5910_p4, %p5904_p1 }
  0x2f   :  { %5914 = shalt.err (!%p5911_p5)
}
  0x30   :  { %s6015_s3 = smov 384   ;;  %s6016_s24 = smov 24  }
  0x31   :  { %28 = dma.hbm_to_vmem [thread:$0]  %s6225_s0, 768, %s23_s22, [#allocation3], %s6015_s3, %s6015_s3, %s6016_s24  }
  0x32   :  { %s6017_s27 = smov [#allocation7]   ;;  %s6018_s29 = smov [#allocation10]  }
  0x33   :  { %s46_s28 = sshll.u32 %s6017_s27, 4  ;;  %s71_s5 = sshll.u32 %s6018_s29, 4  ;;  %s47_s28 = int_to_ptr.vmem [resolvable:$true] %s46_s28  ;;  %s72_s5 = int_to_ptr.vmem [resolvable:$true] %s71_s5 }
  0x34   :  { %s5923_s30 = scalar_lea.vmem %s47_s28, 24576  ;;  %p5928_p7 = scmp.lt.s32.totalorder %s47_s28, %s47_s28 }
  0x35   :  { %p5924_p6 = scmp.ne.s32.totalorder %s47_s28, %s5923_s30  ;;  %p5929_p8 = scmp.lt.s32.totalorder %s5923_s30, %s5923_s30 }
  0x37   :  { %p5930_p9 = por %p5929_p8, %p5928_p7 }
  0x39   :  { %p5931_p10 = pnand %p5930_p9, %p5924_p6 }
  0x3b   :  { %5934 = shalt.err (!%p5931_p10)
}
  0x3c   :  { %52 = dma.hbm_to_vmem [thread:$0]  %s6227_s2, 24576, %s47_s28, [#allocation6], %s6010_s13, %s6010_s13, %s6011_s14  }
  0x3d   :  { %s5943_s0 = scalar_lea.vmem %s72_s5, 64  ;;  %p5948_p12 = scmp.lt.s32.totalorder %s72_s5, %s72_s5 }
  0x3e   :  { %p5944_p11 = scmp.ne.s32.totalorder %s72_s5, %s5943_s0  ;;  %p5949_p13 = scmp.lt.s32.totalorder %s5943_s0, %s5943_s0 }
  0x40   :  { %p5950_p0 = por %p5949_p13, %p5948_p12 }
  0x42   :  { %p5951_p1 = pnand %p5950_p0, %p5944_p11 }
  0x44   :  { %5954 = shalt.err (!%p5951_p1)
}
  0x45   :  { %74 = dma.hbm_to_vmem [thread:$0]  %s6229_s4, 64, %s72_s5, [#allocation9]  }
  0x46   :  { %s6019_s12 = smov [#allocation13]  }
  0x47   :  { %s93_s15 = sshll.u32 %s6019_s12, 4  ;;  %s94_s15 = int_to_ptr.vmem [resolvable:$true] %s93_s15 }
  0x48   :  { %s5963_s16 = scalar_lea.vmem %s94_s15, 16  ;;  %s5967_s1 = scalar_lea.vmem %s94_s15, 32 }
  0x49   :  { %p5964_p2 = scmp.ne.s32.totalorder %s94_s15, %s5963_s16  ;;  %p5968_p3 = scmp.lt.s32.totalorder %s94_s15, %s94_s15 }
  0x4a   :  { %p5969_p4 = scmp.lt.s32.totalorder %s5967_s1, %s5963_s16 }
  0x4c   :  { %p5970_p5 = por %p5969_p4, %p5968_p3 }
  0x4e   :  { %p5971_p6 = pnand %p5970_p5, %p5964_p2 }
  0x50   :  { %5974 = shalt.err (!%p5971_p6)
}
  0x51   :  { %96 = dma.hbm_to_vmem [thread:$0]  %s6231_s6, 16, %s94_s15, [#allocation12]  }
  0x52   :  { %5995 = dma.done.wait [#allocation3], 768  }
  0x53   :  { %5996 = vsyncadd [#allocation3], 4294966528 }
  0x54   :  { %5997 = dma.done.wait [#allocation6], 25856  }
  0x55   :  { %5998 = vsyncadd [#allocation6], 4294941440 }
  0x56   :  { %5999 = dma.done.wait [#allocation9], 41024  }
  0x57   :  { %6000 = vsyncadd [#allocation9], 4294926272 }
  0x58   :  { %6001 = dma.done.wait [#allocation12], 4112  }
  0x59   :  { %6002 = vsyncadd [#allocation12], 4294963184  ;;  %v5007_v0 = vld [vmem:[#allocation8 + $0xe4] ss:$16 sps:$4 sm:$0xff]   ;;  %v5011_v2 = vld [vmem:[#allocation8 + $0xe0] ss:$16 sps:$4 sm:$0xff]  }
  0x5a   :  { %v5009_v1 = vld [vmem:[#allocation8 + $0x2e4] ss:$16 sps:$4 sm:$0xff]   ;;  %2297 = vmatprep.subr.bf16.mxu0 %v5007_v0  ;;  %v5012_v3 = vld [vmem:[#allocation8 + $0x2e0] ss:$16 sps:$4 sm:$0xff]   ;;  %s6020_s4 = smov [#allocation14]  }
  0x5b   :  { %2340 = vmatprep.subr.bf16.mxu1 %v5009_v1  ;;  %v5013_v4 = vld [vmem:[#allocation8 + $0xc4] ss:$16 sps:$4 sm:$0xff]   ;;  %2298 = vmatpush1.bf16.msra.mxu0 %v5011_v2  ;;  %v5017_v6 = vld [vmem:[#allocation8 + $0xc0] ss:$16 sps:$4 sm:$0xff]   ;;  %s4369_s6 = sshll.u32 %s6020_s4, 4  ;;  %s4370_s6 = int_to_ptr.vmem [resolvable:$true] %s4369_s6 }
  0x5c   :  { %2341 = vmatpush1.bf16.msra.mxu1 %v5012_v3  ;;  %v5015_v5 = vld [vmem:[#allocation8 + $0x2c4] ss:$16 sps:$4 sm:$0xff]   ;;  %2299 = vmatprep.subr.bf16.mxu0 %v5013_v4  ;;  %v5018_v7 = vld [vmem:[#allocation8 + $0x2c0] ss:$16 sps:$4 sm:$0xff]   ;;  %s5975_s14 = scalar_lea.vmem %s4370_s6, 256  ;;  %p5980_p8 = scmp.lt.s32.totalorder %s4370_s6, %s4370_s6 }
  0x5d   :  { %2342 = vmatprep.subr.bf16.mxu1 %v5015_v5  ;;  %v5019_v8 = vld [vmem:[#allocation8 + $0xa4] ss:$16 sps:$4 sm:$0xff]   ;;  %v5023_v10 = vld [vmem:[#allocation8 + $0xa0] ss:$16 sps:$4 sm:$0xff]   ;;  %p5976_p7 = scmp.ne.s32.totalorder %s4370_s6, %s5975_s14  ;;  %p5981_p9 = scmp.lt.s32.totalorder %s5975_s14, %s5975_s14 }
  0x5e   :  { %v5021_v9 = vld [vmem:[#allocation8 + $0x2a4] ss:$16 sps:$4 sm:$0xff]   ;;  %v5024_v11 = vld [vmem:[#allocation8 + $0x2a0] ss:$16 sps:$4 sm:$0xff]  }
  0x5f   :  { %2300 = vmatpush1.bf16.msra.mxu0 %v5017_v6  ;;  %v5025_v12 = vld [vmem:[#allocation8 + $0x84] ss:$16 sps:$4 sm:$0xff]   ;;  %v5029_v14 = vld [vmem:[#allocation8 + $0x80] ss:$16 sps:$4 sm:$0xff]   ;;  %p5982_p10 = por %p5981_p9, %p5980_p8 }
  0x60   :  { %2343 = vmatpush1.bf16.msra.mxu1 %v5018_v7  ;;  %2301 = vmatprep.subr.bf16.mxu0 %v5019_v8  ;;  %v5027_v13 = vld [vmem:[#allocation8 + $0x284] ss:$16 sps:$4 sm:$0xff]   ;;  %v5030_v15 = vld [vmem:[#allocation8 + $0x280] ss:$16 sps:$4 sm:$0xff]  }
  0x61   :  { %2344 = vmatprep.subr.bf16.mxu1 %v5021_v9  ;;  %v5031_v16 = vld [vmem:[#allocation8 + $0x64] ss:$16 sps:$4 sm:$0xff]   ;;  %v5035_v18 = vld [vmem:[#allocation8 + $0x60] ss:$16 sps:$4 sm:$0xff]   ;;  %p5983_p11 = pnand %p5982_p10, %p5976_p7 }
  0x62   :  { %v5033_v17 = vld [vmem:[#allocation8 + $0x264] ss:$16 sps:$4 sm:$0xff]   ;;  %v5036_v19 = vld [vmem:[#allocation8 + $0x260] ss:$16 sps:$4 sm:$0xff]  }
  0x63   :  { %2302 = vmatpush1.bf16.msra.mxu0 %v5023_v10  ;;  %v5037_v20 = vld [vmem:[#allocation8 + $0x44] ss:$16 sps:$4 sm:$0xff]   ;;  %v5041_v22 = vld [vmem:[#allocation8 + $0x40] ss:$16 sps:$4 sm:$0xff]  }
  0x64   :  { %2345 = vmatpush1.bf16.msra.mxu1 %v5024_v11  ;;  %2303 = vmatprep.subr.bf16.mxu0 %v5025_v12  ;;  %v5039_v21 = vld [vmem:[#allocation8 + $0x244] ss:$16 sps:$4 sm:$0xff]   ;;  %v5042_v23 = vld [vmem:[#allocation8 + $0x240] ss:$16 sps:$4 sm:$0xff]  }
  0x65   :  { %2346 = vmatprep.subr.bf16.mxu1 %v5027_v13  ;;  %v5043_v24 = vld [vmem:[#allocation8 + $0x24] ss:$16 sps:$4 sm:$0xff]   ;;  %v5047_v26 = vld [vmem:[#allocation8 + $0x20] ss:$16 sps:$4 sm:$0xff]  }
  0x66   :  { %v5045_v25 = vld [vmem:[#allocation8 + $0x224] ss:$16 sps:$4 sm:$0xff]   ;;  %v5048_v27 = vld [vmem:[#allocation8 + $0x220] ss:$16 sps:$4 sm:$0xff]  }
  0x67   :  { %2304 = vmatpush1.bf16.msra.mxu0 %v5029_v14  ;;  %v5049_v28 = vld [vmem:[#allocation8 + $0x4] ss:$16 sps:$4 sm:$0xff]   ;;  %v5053_v30 = vld [vmem:[#allocation8] ss:$16 sps:$4 sm:$0xff]  }
  0x68   :  { %2347 = vmatpush1.bf16.msra.mxu1 %v5030_v15  ;;  %2305 = vmatprep.subr.bf16.mxu0 %v5031_v16  ;;  %v5051_v29 = vld [vmem:[#allocation8 + $0x204] ss:$16 sps:$4 sm:$0xff]   ;;  %v5054_v31 = vld [vmem:[#allocation8 + $0x200] ss:$16 sps:$4 sm:$0xff]  }
  0x69   :  { %2348 = vmatprep.subr.bf16.mxu1 %v5033_v17  ;;  %v5055_v32 = vld [vmem:[#allocation8 + $0x1e4] ss:$16 sps:$4 sm:$0xff]   ;;  %v5059_v34 = vld [vmem:[#allocation8 + $0x1e0] ss:$16 sps:$4 sm:$0xff]  }
  0x6a   :  { %v5057_v33 = vld [vmem:[#allocation8 + $0x3e4] ss:$16 sps:$4 sm:$0xff]   ;;  %v5060_v35 = vld [vmem:[#allocation8 + $0x3e0] ss:$16 sps:$4 sm:$0xff]  }
  0x6b   :  { %2306 = vmatpush1.bf16.msra.mxu0 %v5035_v18  ;;  %v5061_v36 = vld [vmem:[#allocation8 + $0x1c4] ss:$16 sps:$4 sm:$0xff]   ;;  %v5065_v38 = vld [vmem:[#allocation8 + $0x1c0] ss:$16 sps:$4 sm:$0xff]  }
  0x6c   :  { %2349 = vmatpush1.bf16.msra.mxu1 %v5036_v19  ;;  %2307 = vmatprep.subr.bf16.mxu0 %v5037_v20  ;;  %v5063_v37 = vld [vmem:[#allocation8 + $0x3c4] ss:$16 sps:$4 sm:$0xff]   ;;  %v5066_v39 = vld [vmem:[#allocation8 + $0x3c0] ss:$16 sps:$4 sm:$0xff]  }
  0x6d   :  { %2350 = vmatprep.subr.bf16.mxu1 %v5039_v21  ;;  %v5067_v40 = vld [vmem:[#allocation8 + $0x1a4] ss:$16 sps:$4 sm:$0xff]   ;;  %v5071_v42 = vld [vmem:[#allocation8 + $0x1a0] ss:$16 sps:$4 sm:$0xff]  }
  0x6e   :  { %v5069_v41 = vld [vmem:[#allocation8 + $0x3a4] ss:$16 sps:$4 sm:$0xff]   ;;  %v5072_v43 = vld [vmem:[#allocation8 + $0x3a0] ss:$16 sps:$4 sm:$0xff]  }
  0x6f   :  { %2308 = vmatpush1.bf16.msra.mxu0 %v5041_v22  ;;  %v5073_v44 = vld [vmem:[#allocation8 + $0x184] ss:$16 sps:$4 sm:$0xff]   ;;  %v5077_v46 = vld [vmem:[#allocation8 + $0x180] ss:$16 sps:$4 sm:$0xff]  }
  0x70   :  { %2351 = vmatpush1.bf16.msra.mxu1 %v5042_v23  ;;  %2309 = vmatprep.subr.bf16.mxu0 %v5043_v24  ;;  %v5075_v45 = vld [vmem:[#allocation8 + $0x384] ss:$16 sps:$4 sm:$0xff]   ;;  %v5078_v47 = vld [vmem:[#allocation8 + $0x380] ss:$16 sps:$4 sm:$0xff]  }
  0x71   :  { %2352 = vmatprep.subr.bf16.mxu1 %v5045_v25  ;;  %v5079_v48 = vld [vmem:[#allocation8 + $0x164] ss:$16 sps:$4 sm:$0xff]   ;;  %v5083_v52 = vld [vmem:[#allocation8 + $0x160] ss:$16 sps:$4 sm:$0xff]  }
  0x72   :  { %v6090_v49 = vld [vmem:[#allocation5 + $0x4] ss:$40 sps:$4 sm:$0xff]   ;;  %v5084_v53 = vld [vmem:[#allocation8 + $0x360] ss:$16 sps:$4 sm:$0xff]  }
  0x73   :  { %2310 = vmatpush1.bf16.msra.mxu0 %v5047_v26  ;;  %v5081_v50 = vld [vmem:[#allocation8 + $0x364] ss:$16 sps:$4 sm:$0xff]   ;;  %2329 = vmatprep.mubr.bf16.mxu0 %v6090_v49  ;;  %v5089_v56 = vld [vmem:[#allocation8 + $0x140] ss:$16 sps:$4 sm:$0xff]  }
  0x74   :  { %2353 = vmatpush1.bf16.msra.mxu1 %v5048_v27  ;;  %2311 = vmatprep.subr.bf16.mxu0 %v5049_v28  ;;  %v5108_v51 = vld [vmem:[#allocation5 + $0xc] ss:$40 sps:$4 sm:$0xff]   ;;  %v5090_v57 = vld [vmem:[#allocation8 + $0x340] ss:$16 sps:$4 sm:$0xff]  }
  0x75   :  { %2354 = vmatprep.subr.bf16.mxu1 %v5051_v29  ;;  %2372 = vmatprep.mubr.bf16.mxu1 %v5108_v51  ;;  %v5085_v54 = vld [vmem:[#allocation8 + $0x144] ss:$16 sps:$4 sm:$0xff]   ;;  %v5095_v60 = vld [vmem:[#allocation8 + $0x120] ss:$16 sps:$4 sm:$0xff]  }
  0x76   :  { %v5087_v55 = vld [vmem:[#allocation8 + $0x344] ss:$16 sps:$4 sm:$0xff]   ;;  %v5096_v61 = vld [vmem:[#allocation8 + $0x320] ss:$16 sps:$4 sm:$0xff]  }
  0x77   :  { %2312 = vmatpush1.bf16.msra.mxu0 %v5053_v30  ;;  %v5091_v58 = vld [vmem:[#allocation8 + $0x124] ss:$16 sps:$4 sm:$0xff]   ;;  %v5101_v0 = vld [vmem:[#allocation8 + $0x100] ss:$16 sps:$4 sm:$0xff]  }
  0x78   :  { %2355 = vmatpush1.bf16.msra.mxu1 %v5054_v31  ;;  %2313 = vmatprep.subr.bf16.mxu0 %v5055_v32  ;;  %v5093_v59 = vld [vmem:[#allocation8 + $0x324] ss:$16 sps:$4 sm:$0xff]   ;;  %v5102_v1 = vld [vmem:[#allocation8 + $0x300] ss:$16 sps:$4 sm:$0xff]  }
  0x79   :  { %2356 = vmatprep.subr.bf16.mxu1 %v5057_v33  ;;  %v5097_v62 = vld [vmem:[#allocation8 + $0x104] ss:$16 sps:$4 sm:$0xff]   ;;  %v6093_v4 = vld [vmem:[#allocation5] ss:$40 sps:$4 sm:$0xff]  }
  0x7a   :  { %v5099_v63 = vld [vmem:[#allocation8 + $0x304] ss:$16 sps:$4 sm:$0xff]   ;;  %v5106_v5 = vld [vmem:[#allocation5 + $0x8] ss:$40 sps:$4 sm:$0xff]  }
  0x7b   :  { %2314 = vmatpush2.bf16.msra.mxu0 %v5059_v34  ;;  %v5111_v2 = vld [vmem:[#allocation8 + $0x4e4] ss:$16 sps:$4 sm:$0xff]   ;;  %v5109_v6 = vld [vmem:[#allocation8 + $0x4e0] ss:$16 sps:$4 sm:$0xff]  }
  0x7c   :  { %2357 = vmatpush2.bf16.msra.mxu1 %v5060_v35  ;;  %2315 = vmatprep.subr.bf16.mxu0 %v5061_v36  ;;  %v5114_v3 = vld [vmem:[#allocation8 + $0x6e4] ss:$16 sps:$4 sm:$0xff]   ;;  %v5112_v7 = vld [vmem:[#allocation8 + $0x6e0] ss:$16 sps:$4 sm:$0xff]  }
  0x7d   :  { %2358 = vmatprep.subr.bf16.mxu1 %v5063_v37  ;;  %v5117_v8 = vld [vmem:[#allocation8 + $0x4c4] ss:$16 sps:$4 sm:$0xff]   ;;  %v5115_v10 = vld [vmem:[#allocation8 + $0x4c0] ss:$16 sps:$4 sm:$0xff]  }
  0x7e   :  { %v5120_v9 = vld [vmem:[#allocation8 + $0x6c4] ss:$16 sps:$4 sm:$0xff]   ;;  %v5118_v11 = vld [vmem:[#allocation8 + $0x6c0] ss:$16 sps:$4 sm:$0xff]  }
  0x7f   :  { %2316 = vmatpush2.bf16.msra.mxu0 %v5065_v38  ;;  %v5123_v12 = vld [vmem:[#allocation8 + $0x4a4] ss:$16 sps:$4 sm:$0xff]   ;;  %v5121_v14 = vld [vmem:[#allocation8 + $0x4a0] ss:$16 sps:$4 sm:$0xff]  }
  0x80   :  { %2359 = vmatpush2.bf16.msra.mxu1 %v5066_v39  ;;  %2317 = vmatprep.subr.bf16.mxu0 %v5067_v40  ;;  %v5126_v13 = vld [vmem:[#allocation8 + $0x6a4] ss:$16 sps:$4 sm:$0xff]   ;;  %v5124_v15 = vld [vmem:[#allocation8 + $0x6a0] ss:$16 sps:$4 sm:$0xff]  }
  0x81   :  { %2360 = vmatprep.subr.bf16.mxu1 %v5069_v41  ;;  %v5129_v16 = vld [vmem:[#allocation8 + $0x484] ss:$16 sps:$4 sm:$0xff]   ;;  %v5127_v18 = vld [vmem:[#allocation8 + $0x480] ss:$16 sps:$4 sm:$0xff]  }
  0x82   :  { %v5132_v17 = vld [vmem:[#allocation8 + $0x684] ss:$16 sps:$4 sm:$0xff]   ;;  %v5130_v19 = vld [vmem:[#allocation8 + $0x680] ss:$16 sps:$4 sm:$0xff]  }
  0x83   :  { %2318 = vmatpush2.bf16.msra.mxu0 %v5071_v42  ;;  %v5135_v20 = vld [vmem:[#allocation8 + $0x464] ss:$16 sps:$4 sm:$0xff]   ;;  %v5133_v22 = vld [vmem:[#allocation8 + $0x460] ss:$16 sps:$4 sm:$0xff]  }
  0x84   :  { %2361 = vmatpush2.bf16.msra.mxu1 %v5072_v43  ;;  %2319 = vmatprep.subr.bf16.mxu0 %v5073_v44  ;;  %v5138_v21 = vld [vmem:[#allocation8 + $0x664] ss:$16 sps:$4 sm:$0xff]   ;;  %v5136_v23 = vld [vmem:[#allocation8 + $0x660] ss:$16 sps:$4 sm:$0xff]  }
  0x85   :  { %2362 = vmatprep.subr.bf16.mxu1 %v5075_v45  ;;  %v5141_v24 = vld [vmem:[#allocation8 + $0x444] ss:$16 sps:$4 sm:$0xff]   ;;  %v5139_v26 = vld [vmem:[#allocation8 + $0x440] ss:$16 sps:$4 sm:$0xff]  }
  0x86   :  { %v5144_v25 = vld [vmem:[#allocation8 + $0x644] ss:$16 sps:$4 sm:$0xff]   ;;  %v5142_v27 = vld [vmem:[#allocation8 + $0x640] ss:$16 sps:$4 sm:$0xff]  }
  0x87   :  { %2320 = vmatpush2.bf16.msra.mxu0 %v5077_v46  ;;  %v5147_v28 = vld [vmem:[#allocation8 + $0x424] ss:$16 sps:$4 sm:$0xff]   ;;  %v5145_v30 = vld [vmem:[#allocation8 + $0x420] ss:$16 sps:$4 sm:$0xff]  }
  0x88   :  { %2363 = vmatpush2.bf16.msra.mxu1 %v5078_v47  ;;  %2321 = vmatprep.subr.bf16.mxu0 %v5079_v48  ;;  %v5150_v29 = vld [vmem:[#allocation8 + $0x624] ss:$16 sps:$4 sm:$0xff]   ;;  %v5148_v31 = vld [vmem:[#allocation8 + $0x620] ss:$16 sps:$4 sm:$0xff]  }
  0x89   :  { %2364 = vmatprep.subr.bf16.mxu1 %v5081_v50  ;;  %v5153_v32 = vld [vmem:[#allocation8 + $0x404] ss:$16 sps:$4 sm:$0xff]   ;;  %v5151_v36 = vld [vmem:[#allocation8 + $0x400] ss:$16 sps:$4 sm:$0xff]  }
  0x8a   :  { %v5156_v33 = vld [vmem:[#allocation8 + $0x604] ss:$16 sps:$4 sm:$0xff]   ;;  %v5154_v37 = vld [vmem:[#allocation8 + $0x600] ss:$16 sps:$4 sm:$0xff]  }
  0x8b   :  { %2322 = vmatpush2.bf16.msra.mxu0 %v5083_v52  ;;  %v6096_v34 = vld [vmem:[#allocation5 + $0x14] ss:$40 sps:$4 sm:$0xff]   ;;  %v5157_v40 = vld [vmem:[#allocation8 + $0x5e0] ss:$16 sps:$4 sm:$0xff]  }
  0x8c   :  { %2365 = vmatpush2.bf16.msra.mxu1 %v5084_v53  ;;  %2323 = vmatprep.subr.bf16.mxu0 %v5085_v54  ;;  %v5210_v35 = vld [vmem:[#allocation5 + $0x1c] ss:$40 sps:$4 sm:$0xff]   ;;  %v5160_v41 = vld [vmem:[#allocation8 + $0x7e0] ss:$16 sps:$4 sm:$0xff]  }
  0x8d   :  { %2366 = vmatprep.subr.bf16.mxu1 %v5087_v55  ;;  %v5159_v38 = vld [vmem:[#allocation8 + $0x5e4] ss:$16 sps:$4 sm:$0xff]   ;;  %v5163_v44 = vld [vmem:[#allocation8 + $0x5c0] ss:$16 sps:$4 sm:$0xff]  }
  0x8e   :  { %v5162_v39 = vld [vmem:[#allocation8 + $0x7e4] ss:$16 sps:$4 sm:$0xff]   ;;  %v5166_v45 = vld [vmem:[#allocation8 + $0x7c0] ss:$16 sps:$4 sm:$0xff]  }
  0x8f   :  { %2324 = vmatpush2.bf16.msra.mxu0 %v5089_v56  ;;  %v5165_v42 = vld [vmem:[#allocation8 + $0x5c4] ss:$16 sps:$4 sm:$0xff]   ;;  %v5169_v48 = vld [vmem:[#allocation8 + $0x5a0] ss:$16 sps:$4 sm:$0xff]  }
  0x90   :  { %2367 = vmatpush2.bf16.msra.mxu1 %v5090_v57  ;;  %2325 = vmatprep.subr.bf16.mxu0 %v5091_v58  ;;  %v5168_v43 = vld [vmem:[#allocation8 + $0x7c4] ss:$16 sps:$4 sm:$0xff]   ;;  %v5172_v50 = vld [vmem:[#allocation8 + $0x7a0] ss:$16 sps:$4 sm:$0xff]  }
  0x91   :  { %2368 = vmatprep.subr.bf16.mxu1 %v5093_v59  ;;  %v5171_v46 = vld [vmem:[#allocation8 + $0x5a4] ss:$16 sps:$4 sm:$0xff]   ;;  %v5175_v53 = vld [vmem:[#allocation8 + $0x580] ss:$16 sps:$4 sm:$0xff]  }
  0x92   :  { %v5174_v47 = vld [vmem:[#allocation8 + $0x7a4] ss:$16 sps:$4 sm:$0xff]   ;;  %v5178_v54 = vld [vmem:[#allocation8 + $0x780] ss:$16 sps:$4 sm:$0xff]  }
  0x93   :  { %2326 = vmatpush2.bf16.msra.mxu0 %v5095_v60  ;;  %v5177_v51 = vld [vmem:[#allocation8 + $0x584] ss:$16 sps:$4 sm:$0xff]   ;;  %v5181_v57 = vld [vmem:[#allocation8 + $0x560] ss:$16 sps:$4 sm:$0xff]  }
  0x94   :  { %2369 = vmatpush2.bf16.msra.mxu1 %v5096_v61  ;;  %2327 = vmatprep.subr.bf16.mxu0 %v5097_v62  ;;  %v5180_v52 = vld [vmem:[#allocation8 + $0x784] ss:$16 sps:$4 sm:$0xff]   ;;  %v5184_v58 = vld [vmem:[#allocation8 + $0x760] ss:$16 sps:$4 sm:$0xff]  }
  0x95   :  { %2370 = vmatprep.subr.bf16.mxu1 %v5099_v63  ;;  %v5183_v55 = vld [vmem:[#allocation8 + $0x564] ss:$16 sps:$4 sm:$0xff]   ;;  %v5187_v61 = vld [vmem:[#allocation8 + $0x540] ss:$16 sps:$4 sm:$0xff]  }
  0x96   :  { %v5186_v56 = vld [vmem:[#allocation8 + $0x764] ss:$16 sps:$4 sm:$0xff]   ;;  %v5190_v62 = vld [vmem:[#allocation8 + $0x740] ss:$16 sps:$4 sm:$0xff]  }
  0x97   :  { %2328 = vmatpush2.bf16.msra.mxu0 %v5101_v0  ;;  %v5189_v59 = vld [vmem:[#allocation8 + $0x544] ss:$16 sps:$4 sm:$0xff]  }
  0x98   :  { %2371 = vmatpush2.bf16.msra.mxu1 %v5102_v1  ;;  %2383 = vmatprep.subr.bf16.mxu0 %v5111_v2  ;;  %v5192_v60 = vld [vmem:[#allocation8 + $0x744] ss:$16 sps:$4 sm:$0xff]   ;;  %v5193_v1 = vld [vmem:[#allocation8 + $0x520] ss:$16 sps:$4 sm:$0xff]  }
  0x99   :  { %2426 = vmatprep.subr.bf16.mxu1 %v5114_v3  ;;  %v5195_v63 = vld [vmem:[#allocation8 + $0x524] ss:$16 sps:$4 sm:$0xff]   ;;  %v5196_v2 = vld [vmem:[#allocation8 + $0x720] ss:$16 sps:$4 sm:$0xff]  }
  0x9a   :  { %2330 = vmatmul.mubr.bf16.vlgmr.msra.gmra.mxu0 %v6093_v4  ;;  %v5198_v0 = vld [vmem:[#allocation8 + $0x724] ss:$16 sps:$4 sm:$0xff]  }
  0x9b   :  { %2373 = vmatmul.mubr.bf16.vlgmr.msra.gmra.mxu1 %v5106_v5  ;;  %2384 = vmatpush1.bf16.msra.mxu0 %v5109_v6  ;;  %v5201_v3 = vld [vmem:[#allocation8 + $0x504] ss:$16 sps:$4 sm:$0xff]   ;;  %v5199_v6 = vld [vmem:[#allocation8 + $0x500] ss:$16 sps:$4 sm:$0xff]  }
  0x9c   :  { %2427 = vmatpush1.bf16.msra.mxu1 %v5112_v7  ;;  %2385 = vmatprep.subr.bf16.mxu0 %v5117_v8  ;;  %v5204_v5 = vld [vmem:[#allocation8 + $0x704] ss:$16 sps:$4 sm:$0xff]   ;;  %v5202_v7 = vld [vmem:[#allocation8 + $0x700] ss:$16 sps:$4 sm:$0xff]  }
  0x9d   :  { %2428 = vmatprep.subr.bf16.mxu1 %v5120_v9  ;;  %2415 = vmatprep.mubr.bf16.mxu0 %v6096_v34  ;;  %v5213_v8 = vld [vmem:[#allocation8 + $0x8e4] ss:$16 sps:$4 sm:$0xff]   ;;  %v5216_v9 = vld [vmem:[#allocation8 + $0xec] ss:$16 sps:$4 sm:$0xff]  }
  0x9e   :  { %2458 = vmatprep.mubr.bf16.mxu1 %v5210_v35  ;;  %v5249_v35 = vld [vmem:[#allocation8 + $0x824] ss:$16 sps:$4 sm:$0xff]  }
  0x9f   :  { %2386 = vmatpush1.bf16.msra.mxu0 %v5115_v10  ;;  %v6099_v10 = vld [vmem:[#allocation5 + $0x10] ss:$40 sps:$4 sm:$0xff]  }
  0xa0   :  { %2429 = vmatpush1.bf16.msra.mxu1 %v5118_v11  ;;  %2387 = vmatprep.subr.bf16.mxu0 %v5123_v12  ;;  %v5208_v11 = vld [vmem:[#allocation5 + $0x18] ss:$40 sps:$4 sm:$0xff]  }
  0xa1   :  { %2430 = vmatprep.subr.bf16.mxu1 %v5126_v13  ;;  %v5211_v12 = vld [vmem:[#allocation8 + $0x8e0] ss:$16 sps:$4 sm:$0xff]   ;;  %v5214_v13 = vld [vmem:[#allocation8 + $0xe8] ss:$16 sps:$4 sm:$0xff]  }
  0xa3   :  { %2388 = vmatpush1.bf16.msra.mxu0 %v5121_v14  ;;  %v5219_v14 = vld [vmem:[#allocation8 + $0x8c4] ss:$16 sps:$4 sm:$0xff]  }
  0xa4   :  { %2431 = vmatpush1.bf16.msra.mxu1 %v5124_v15  ;;  %2389 = vmatprep.subr.bf16.mxu0 %v5129_v16  ;;  %v5222_v15 = vld [vmem:[#allocation8 + $0xcc] ss:$16 sps:$4 sm:$0xff]   ;;  %v5217_v16 = vld [vmem:[#allocation8 + $0x8c0] ss:$16 sps:$4 sm:$0xff]  }
  0xa5   :  { %2432 = vmatprep.subr.bf16.mxu1 %v5132_v17  ;;  %v5220_v17 = vld [vmem:[#allocation8 + $0xc8] ss:$16 sps:$4 sm:$0xff]  }
  0xa7   :  { %2390 = vmatpush1.bf16.msra.mxu0 %v5127_v18  ;;  %v5225_v18 = vld [vmem:[#allocation8 + $0x8a4] ss:$16 sps:$4 sm:$0xff]  }
  0xa8   :  { %2433 = vmatpush1.bf16.msra.mxu1 %v5130_v19  ;;  %2391 = vmatprep.subr.bf16.mxu0 %v5135_v20  ;;  %v5228_v19 = vld [vmem:[#allocation8 + $0xac] ss:$16 sps:$4 sm:$0xff]  }
  0xa9   :  { %2434 = vmatprep.subr.bf16.mxu1 %v5138_v21  ;;  %v6102_v20 = vld [vmem:[#allocation5 + $0x24] ss:$40 sps:$4 sm:$0xff]   ;;  %v5223_v21 = vld [vmem:[#allocation8 + $0x8a0] ss:$16 sps:$4 sm:$0xff]  }
  0xab   :  { %2392 = vmatpush1.bf16.msra.mxu0 %v5133_v22  ;;  %v5226_v22 = vld [vmem:[#allocation8 + $0xa8] ss:$16 sps:$4 sm:$0xff]  }
  0xac   :  { %2435 = vmatpush1.bf16.msra.mxu1 %v5136_v23  ;;  %2393 = vmatprep.subr.bf16.mxu0 %v5141_v24  ;;  %v5231_v23 = vld [vmem:[#allocation8 + $0x884] ss:$16 sps:$4 sm:$0xff]   ;;  %v5234_v24 = vld [vmem:[#allocation8 + $0x8c] ss:$16 sps:$4 sm:$0xff]  }
  0xad   :  { %2436 = vmatprep.subr.bf16.mxu1 %v5144_v25  ;;  %v5229_v25 = vld [vmem:[#allocation8 + $0x880] ss:$16 sps:$4 sm:$0xff]  }
  0xaf   :  { %2394 = vmatpush1.bf16.msra.mxu0 %v5139_v26  ;;  %v5232_v26 = vld [vmem:[#allocation8 + $0x88] ss:$16 sps:$4 sm:$0xff]  }
  0xb0   :  { %2437 = vmatpush1.bf16.msra.mxu1 %v5142_v27  ;;  %2395 = vmatprep.subr.bf16.mxu0 %v5147_v28  ;;  %v5237_v27 = vld [vmem:[#allocation8 + $0x864] ss:$16 sps:$4 sm:$0xff]   ;;  %v5240_v28 = vld [vmem:[#allocation8 + $0x6c] ss:$16 sps:$4 sm:$0xff]  }
  0xb1   :  { %2438 = vmatprep.subr.bf16.mxu1 %v5150_v29  ;;  %v5235_v29 = vld [vmem:[#allocation8 + $0x860] ss:$16 sps:$4 sm:$0xff]  }
  0xb3   :  { %2396 = vmatpush1.bf16.msra.mxu0 %v5145_v30  ;;  %v5243_v30 = vld [vmem:[#allocation8 + $0x844] ss:$16 sps:$4 sm:$0xff]  }
  0xb4   :  { %2439 = vmatpush1.bf16.msra.mxu1 %v5148_v31  ;;  %2397 = vmatprep.subr.bf16.mxu0 %v5153_v32  ;;  %v5246_v31 = vld [vmem:[#allocation8 + $0x4c] ss:$16 sps:$4 sm:$0xff]   ;;  %v5241_v32 = vld [vmem:[#allocation8 + $0x840] ss:$16 sps:$4 sm:$0xff]  }
  0xb5   :  { %2440 = vmatprep.subr.bf16.mxu1 %v5156_v33  ;;  %v5244_v33 = vld [vmem:[#allocation8 + $0x48] ss:$16 sps:$4 sm:$0xff]  }
  0xb7   :  { %2398 = vmatpush1.bf16.msra.mxu0 %v5151_v36  ;;  %v5252_v36 = vld [vmem:[#allocation8 + $0x2c] ss:$16 sps:$4 sm:$0xff]  }
  0xb8   :  { %2441 = vmatpush1.bf16.msra.mxu1 %v5154_v37  ;;  %2399 = vmatprep.subr.bf16.mxu0 %v5159_v38  ;;  %v5247_v37 = vld [vmem:[#allocation8 + $0x820] ss:$16 sps:$4 sm:$0xff]   ;;  %v5250_v38 = vld [vmem:[#allocation8 + $0x28] ss:$16 sps:$4 sm:$0xff]  }
  0xb9   :  { %2442 = vmatprep.subr.bf16.mxu1 %v5162_v39  ;;  %v5255_v39 = vld [vmem:[#allocation8 + $0x804] ss:$16 sps:$4 sm:$0xff]  }
  0xbb   :  { %2400 = vmatpush2.bf16.msra.mxu0 %v5157_v40  ;;  %v5258_v40 = vld [vmem:[#allocation8 + $0xc] ss:$16 sps:$4 sm:$0xff]  }
  0xbc   :  { %2443 = vmatpush2.bf16.msra.mxu1 %v5160_v41  ;;  %2401 = vmatprep.subr.bf16.mxu0 %v5165_v42  ;;  %v5253_v41 = vld [vmem:[#allocation8 + $0x800] ss:$16 sps:$4 sm:$0xff]   ;;  %v5256_v42 = vld [vmem:[#allocation8 + $0x8] ss:$16 sps:$4 sm:$0xff]  }
  0xbd   :  { %2444 = vmatprep.subr.bf16.mxu1 %v5168_v43  ;;  %v5261_v43 = vld [vmem:[#allocation8 + $0x9e4] ss:$16 sps:$4 sm:$0xff]  }
  0xbf   :  { %2402 = vmatpush2.bf16.msra.mxu0 %v5163_v44  ;;  %v5264_v44 = vld [vmem:[#allocation8 + $0x1ec] ss:$16 sps:$4 sm:$0xff]  }
  0xc0   :  { %2445 = vmatpush2.bf16.msra.mxu1 %v5166_v45  ;;  %2403 = vmatprep.subr.bf16.mxu0 %v5171_v46  ;;  %v5259_v45 = vld [vmem:[#allocation8 + $0x9e0] ss:$16 sps:$4 sm:$0xff]   ;;  %v5262_v46 = vld [vmem:[#allocation8 + $0x1e8] ss:$16 sps:$4 sm:$0xff]  }
  0xc1   :  { %2446 = vmatprep.subr.bf16.mxu1 %v5174_v47  ;;  %v5267_v47 = vld [vmem:[#allocation8 + $0x9c4] ss:$16 sps:$4 sm:$0xff]  }
  0xc3   :  { %2404 = vmatpush2.bf16.msra.mxu0 %v5169_v48  ;;  %v5270_v48 = vld [vmem:[#allocation8 + $0x1cc] ss:$16 sps:$4 sm:$0xff]  }
  0xc4   :  { %2447 = vmatpush2.bf16.msra.mxu1 %v5172_v50  ;;  %2405 = vmatprep.subr.bf16.mxu0 %v5177_v51  ;;  %v5265_v50 = vld [vmem:[#allocation8 + $0x9c0] ss:$16 sps:$4 sm:$0xff]   ;;  %v5268_v51 = vld [vmem:[#allocation8 + $0x1c8] ss:$16 sps:$4 sm:$0xff]  }
  0xc5   :  { %2448 = vmatprep.subr.bf16.mxu1 %v5180_v52  ;;  %v5273_v52 = vld [vmem:[#allocation8 + $0x9a4] ss:$16 sps:$4 sm:$0xff]  }
  0xc7   :  { %2406 = vmatpush2.bf16.msra.mxu0 %v5175_v53  ;;  %v5276_v53 = vld [vmem:[#allocation8 + $0x1ac] ss:$16 sps:$4 sm:$0xff]  }
  0xc8   :  { %2449 = vmatpush2.bf16.msra.mxu1 %v5178_v54  ;;  %2407 = vmatprep.subr.bf16.mxu0 %v5183_v55  ;;  %v5271_v54 = vld [vmem:[#allocation8 + $0x9a0] ss:$16 sps:$4 sm:$0xff]   ;;  %v5274_v55 = vld [vmem:[#allocation8 + $0x1a8] ss:$16 sps:$4 sm:$0xff]  }
  0xc9   :  { %2450 = vmatprep.subr.bf16.mxu1 %v5186_v56  ;;  %v5279_v56 = vld [vmem:[#allocation8 + $0x984] ss:$16 sps:$4 sm:$0xff]  }
  0xcb   :  { %2408 = vmatpush2.bf16.msra.mxu0 %v5181_v57  ;;  %v5282_v57 = vld [vmem:[#allocation8 + $0x18c] ss:$16 sps:$4 sm:$0xff]  }
  0xcc   :  { %2451 = vmatpush2.bf16.msra.mxu1 %v5184_v58  ;;  %2409 = vmatprep.subr.bf16.mxu0 %v5189_v59  ;;  %v5277_v58 = vld [vmem:[#allocation8 + $0x980] ss:$16 sps:$4 sm:$0xff]   ;;  %v5280_v59 = vld [vmem:[#allocation8 + $0x188] ss:$16 sps:$4 sm:$0xff]  }
  0xcd   :  { %2452 = vmatprep.subr.bf16.mxu1 %v5192_v60  ;;  %v5285_v60 = vld [vmem:[#allocation8 + $0x964] ss:$16 sps:$4 sm:$0xff]  }
  0xcf   :  { %2410 = vmatpush2.bf16.msra.mxu0 %v5187_v61  ;;  %v5288_v61 = vld [vmem:[#allocation8 + $0x16c] ss:$16 sps:$4 sm:$0xff]  }
  0xd0   :  { %2453 = vmatpush2.bf16.msra.mxu1 %v5190_v62  ;;  %2411 = vmatprep.subr.bf16.mxu0 %v5195_v63  ;;  %v5283_v62 = vld [vmem:[#allocation8 + $0x960] ss:$16 sps:$4 sm:$0xff]   ;;  %v5286_v63 = vld [vmem:[#allocation8 + $0x168] ss:$16 sps:$4 sm:$0xff]  }
  0xd1   :  { %2454 = vmatprep.subr.bf16.mxu1 %v5198_v0  ;;  %v5291_v0 = vld [vmem:[#allocation8 + $0x944] ss:$16 sps:$4 sm:$0xff]  }
  0xd3   :  { %2412 = vmatpush2.bf16.msra.mxu0 %v5193_v1  ;;  %v5294_v1 = vld [vmem:[#allocation8 + $0x14c] ss:$16 sps:$4 sm:$0xff]  }
  0xd4   :  { %2455 = vmatpush2.bf16.msra.mxu1 %v5196_v2  ;;  %2413 = vmatprep.subr.bf16.mxu0 %v5201_v3  ;;  %v5289_v2 = vld [vmem:[#allocation8 + $0x940] ss:$16 sps:$4 sm:$0xff]   ;;  %v5292_v3 = vld [vmem:[#allocation8 + $0x148] ss:$16 sps:$4 sm:$0xff]  }
  0xd5   :  { %2456 = vmatprep.subr.bf16.mxu1 %v5204_v5  ;;  %v5297_v5 = vld [vmem:[#allocation8 + $0x924] ss:$16 sps:$4 sm:$0xff]  }
  0xd7   :  { %2414 = vmatpush2.bf16.msra.mxu0 %v5199_v6  ;;  %v5300_v6 = vld [vmem:[#allocation8 + $0x12c] ss:$16 sps:$4 sm:$0xff]  }
  0xd8   :  { %2457 = vmatpush2.bf16.msra.mxu1 %v5202_v7  ;;  %2469 = vmatprep.subr.bf16.mxu0 %v5213_v8  ;;  %v5295_v7 = vld [vmem:[#allocation8 + $0x920] ss:$16 sps:$4 sm:$0xff]   ;;  %v5298_v8 = vld [vmem:[#allocation8 + $0x128] ss:$16 sps:$4 sm:$0xff]  }
  0xd9   :  { %2512 = vmatprep.subr.bf16.mxu1 %v5216_v9  ;;  %v5303_v9 = vld [vmem:[#allocation8 + $0x904] ss:$16 sps:$4 sm:$0xff]  }
  0xda   :  { %2416 = vmatmul.mubr.bf16.vlgmr.msra.gmra.mxu0 %v6099_v10 }
  0xdb   :  { %2459 = vmatmul.mubr.bf16.vlgmr.msra.gmra.mxu1 %v5208_v11  ;;  %2470 = vmatpush1.bf16.msra.mxu0 %v5211_v12  ;;  %v5306_v11 = vld [vmem:[#allocation8 + $0x10c] ss:$16 sps:$4 sm:$0xff]   ;;  %v5301_v12 = vld [vmem:[#allocation8 + $0x900] ss:$16 sps:$4 sm:$0xff]  }
  0xdc   :  { %2513 = vmatpush1.bf16.msra.mxu1 %v5214_v13  ;;  %2471 = vmatprep.subr.bf16.mxu0 %v5219_v14  ;;  %v5304_v13 = vld [vmem:[#allocation8 + $0x108] ss:$16 sps:$4 sm:$0xff]   ;;  %v5312_v14 = vld [vmem:[#allocation8 + $0x2ec] ss:$16 sps:$4 sm:$0xff]  }
  0xdd   :  { %2514 = vmatprep.subr.bf16.mxu1 %v5222_v15  ;;  %2544 = vmatprep.mubr.bf16.mxu1 %v6090_v49  ;;  %v5238_v49 = vld [vmem:[#allocation8 + $0x68] ss:$16 sps:$4 sm:$0xff]   ;;  %v5315_v15 = vld [vmem:[#allocation8 + $0x4ec] ss:$16 sps:$4 sm:$0xff]  }
  0xde   :  { %2501 = vmatprep.mubr.bf16.mxu0 %v6102_v20 }
  0xdf   :  { %2472 = vmatpush1.bf16.msra.mxu0 %v5217_v16  ;;  %v6106_v16 = vld [vmem:[#allocation5 + $0x20] ss:$40 sps:$4 sm:$0xff]  }
  0xe0   :  { %2515 = vmatpush1.bf16.msra.mxu1 %v5220_v17  ;;  %2473 = vmatprep.subr.bf16.mxu0 %v5225_v18  ;;  %v5310_v17 = vld [vmem:[#allocation8 + $0x2e8] ss:$16 sps:$4 sm:$0xff]  }
  0xe1   :  { %2516 = vmatprep.subr.bf16.mxu1 %v5228_v19  ;;  %v5313_v18 = vld [vmem:[#allocation8 + $0x4e8] ss:$16 sps:$4 sm:$0xff]   ;;  %v5318_v19 = vld [vmem:[#allocation8 + $0x2cc] ss:$16 sps:$4 sm:$0xff]  }
  0xe3   :  { %2474 = vmatpush1.bf16.msra.mxu0 %v5223_v21  ;;  %v5321_v21 = vld [vmem:[#allocation8 + $0x4cc] ss:$16 sps:$4 sm:$0xff]  }
  0xe4   :  { %2517 = vmatpush1.bf16.msra.mxu1 %v5226_v22  ;;  %2475 = vmatprep.subr.bf16.mxu0 %v5231_v23  ;;  %v5316_v22 = vld [vmem:[#allocation8 + $0x2c8] ss:$16 sps:$4 sm:$0xff]  }
  0xe5   :  { %2518 = vmatprep.subr.bf16.mxu1 %v5234_v24  ;;  %v5319_v23 = vld [vmem:[#allocation8 + $0x4c8] ss:$16 sps:$4 sm:$0xff]   ;;  %v5324_v24 = vld [vmem:[#allocation8 + $0x2ac] ss:$16 sps:$4 sm:$0xff]  }
  0xe7   :  { %2476 = vmatpush1.bf16.msra.mxu0 %v5229_v25  ;;  %v5327_v25 = vld [vmem:[#allocation8 + $0x4ac] ss:$16 sps:$4 sm:$0xff]  }
  0xe8   :  { %2519 = vmatpush1.bf16.msra.mxu1 %v5232_v26  ;;  %2477 = vmatprep.subr.bf16.mxu0 %v5237_v27  ;;  %v5831_v26 = vld [vmem:[#allocation5 + $0xc] ss:$40 sps:$4 sm:$0xff]   ;;  %v5322_v27 = vld [vmem:[#allocation8 + $0x2a8] ss:$16 sps:$4 sm:$0xff]  }
  0xe9   :  { %2520 = vmatprep.subr.bf16.mxu1 %v5240_v28  ;;  %v5325_v28 = vld [vmem:[#allocation8 + $0x4a8] ss:$16 sps:$4 sm:$0xff]  }
  0xeb   :  { %2478 = vmatpush1.bf16.msra.mxu0 %v5235_v29  ;;  %v5330_v29 = vld [vmem:[#allocation8 + $0x28c] ss:$16 sps:$4 sm:$0xff]  }
  0xec   :  { %2521 = vmatpush1.bf16.msra.mxu1 %v5238_v49  ;;  %2479 = vmatprep.subr.bf16.mxu0 %v5243_v30  ;;  %v5328_v49 = vld [vmem:[#allocation8 + $0x288] ss:$16 sps:$4 sm:$0xff]  }
  0xed   :  { %2522 = vmatprep.subr.bf16.mxu1 %v5246_v31  ;;  %v5331_v30 = vld [vmem:[#allocation8 + $0x488] ss:$16 sps:$4 sm:$0xff]   ;;  %v5336_v31 = vld [vmem:[#allocation8 + $0x26c] ss:$16 sps:$4 sm:$0xff]  }
  0xef   :  { %2480 = vmatpush1.bf16.msra.mxu0 %v5241_v32  ;;  %v5339_v32 = vld [vmem:[#allocation8 + $0x46c] ss:$16 sps:$4 sm:$0xff]  }
  0xf0   :  { %2523 = vmatpush1.bf16.msra.mxu1 %v5244_v33  ;;  %2481 = vmatprep.subr.bf16.mxu0 %v5249_v35  ;;  %v5334_v33 = vld [vmem:[#allocation8 + $0x268] ss:$16 sps:$4 sm:$0xff]  }
  0xf1   :  { %2524 = vmatprep.subr.bf16.mxu1 %v5252_v36  ;;  %v5337_v35 = vld [vmem:[#allocation8 + $0x468] ss:$16 sps:$4 sm:$0xff]   ;;  %v5345_v36 = vld [vmem:[#allocation8 + $0x44c] ss:$16 sps:$4 sm:$0xff]  }
  0xf3   :  { %2482 = vmatpush1.bf16.msra.mxu0 %v5247_v37  ;;  %v5340_v37 = vld [vmem:[#allocation8 + $0x248] ss:$16 sps:$4 sm:$0xff]  }
  0xf4   :  { %2525 = vmatpush1.bf16.msra.mxu1 %v5250_v38  ;;  %2483 = vmatprep.subr.bf16.mxu0 %v5255_v39  ;;  %v5343_v38 = vld [vmem:[#allocation8 + $0x448] ss:$16 sps:$4 sm:$0xff]   ;;  %v5348_v39 = vld [vmem:[#allocation8 + $0x22c] ss:$16 sps:$4 sm:$0xff]  }
  0xf5   :  { %2526 = vmatprep.subr.bf16.mxu1 %v5258_v40  ;;  %v5351_v40 = vld [vmem:[#allocation8 + $0x42c] ss:$16 sps:$4 sm:$0xff]  }
  0xf7   :  { %2484 = vmatpush1.bf16.msra.mxu0 %v5253_v41  ;;  %v5346_v41 = vld [vmem:[#allocation8 + $0x228] ss:$16 sps:$4 sm:$0xff]  }
  0xf8   :  { %2527 = vmatpush1.bf16.msra.mxu1 %v5256_v42  ;;  %2485 = vmatprep.subr.bf16.mxu0 %v5261_v43  ;;  %v5349_v42 = vld [vmem:[#allocation8 + $0x428] ss:$16 sps:$4 sm:$0xff]   ;;  %v5354_v43 = vld [vmem:[#allocation8 + $0x20c] ss:$16 sps:$4 sm:$0xff]  }
  0xf9   :  { %2528 = vmatprep.subr.bf16.mxu1 %v5264_v44  ;;  %v5357_v44 = vld [vmem:[#allocation8 + $0x40c] ss:$16 sps:$4 sm:$0xff]  }
  0xfb   :  { %2486 = vmatpush2.bf16.msra.mxu0 %v5259_v45  ;;  %v5352_v45 = vld [vmem:[#allocation8 + $0x208] ss:$16 sps:$4 sm:$0xff]  }
  0xfc   :  { %2529 = vmatpush2.bf16.msra.mxu1 %v5262_v46  ;;  %2487 = vmatprep.subr.bf16.mxu0 %v5267_v47  ;;  %v5355_v46 = vld [vmem:[#allocation8 + $0x408] ss:$16 sps:$4 sm:$0xff]   ;;  %v5360_v47 = vld [vmem:[#allocation8 + $0x3ec] ss:$16 sps:$4 sm:$0xff]  }
  0xfd   :  { %2530 = vmatprep.subr.bf16.mxu1 %v5270_v48  ;;  %v5363_v48 = vld [vmem:[#allocation8 + $0x5ec] ss:$16 sps:$4 sm:$0xff]  }
  0xff   :  { %2488 = vmatpush2.bf16.msra.mxu0 %v5265_v50  ;;  %v5358_v50 = vld [vmem:[#allocation8 + $0x3e8] ss:$16 sps:$4 sm:$0xff]  }
 0x100   :  { %2531 = vmatpush2.bf16.msra.mxu1 %v5268_v51  ;;  %2489 = vmatprep.subr.bf16.mxu0 %v5273_v52  ;;  %v5361_v51 = vld [vmem:[#allocation8 + $0x5e8] ss:$16 sps:$4 sm:$0xff]   ;;  %v5366_v52 = vld [vmem:[#allocation8 + $0x3cc] ss:$16 sps:$4 sm:$0xff]  }
 0x101   :  { %2532 = vmatprep.subr.bf16.mxu1 %v5276_v53  ;;  %v5369_v53 = vld [vmem:[#allocation8 + $0x5cc] ss:$16 sps:$4 sm:$0xff]  }
 0x103   :  { %2490 = vmatpush2.bf16.msra.mxu0 %v5271_v54  ;;  %v5364_v54 = vld [vmem:[#allocation8 + $0x3c8] ss:$16 sps:$4 sm:$0xff]  }
 0x104   :  { %2533 = vmatpush2.bf16.msra.mxu1 %v5274_v55  ;;  %2491 = vmatprep.subr.bf16.mxu0 %v5279_v56  ;;  %v5367_v55 = vld [vmem:[#allocation8 + $0x5c8] ss:$16 sps:$4 sm:$0xff]   ;;  %v5372_v56 = vld [vmem:[#allocation8 + $0x3ac] ss:$16 sps:$4 sm:$0xff]  }
 0x105   :  { %2534 = vmatprep.subr.bf16.mxu1 %v5282_v57  ;;  %v5375_v57 = vld [vmem:[#allocation8 + $0x5ac] ss:$16 sps:$4 sm:$0xff]  }
 0x107   :  { %2492 = vmatpush2.bf16.msra.mxu0 %v5277_v58  ;;  %v5370_v58 = vld [vmem:[#allocation8 + $0x3a8] ss:$16 sps:$4 sm:$0xff]  }
 0x108   :  { %2535 = vmatpush2.bf16.msra.mxu1 %v5280_v59  ;;  %2493 = vmatprep.subr.bf16.mxu0 %v5285_v60  ;;  %v5373_v59 = vld [vmem:[#allocation8 + $0x5a8] ss:$16 sps:$4 sm:$0xff]   ;;  %v5378_v60 = vld [vmem:[#allocation8 + $0x38c] ss:$16 sps:$4 sm:$0xff]  }
 0x109   :  { %2536 = vmatprep.subr.bf16.mxu1 %v5288_v61  ;;  %v5381_v61 = vld [vmem:[#allocation8 + $0x58c] ss:$16 sps:$4 sm:$0xff]  }
 0x10b   :  { %2494 = vmatpush2.bf16.msra.mxu0 %v5283_v62  ;;  %v5376_v62 = vld [vmem:[#allocation8 + $0x388] ss:$16 sps:$4 sm:$0xff]  }
 0x10c   :  { %2537 = vmatpush2.bf16.msra.mxu1 %v5286_v63  ;;  %2495 = vmatprep.subr.bf16.mxu0 %v5291_v0  ;;  %v5379_v63 = vld [vmem:[#allocation8 + $0x588] ss:$16 sps:$4 sm:$0xff]   ;;  %v5384_v0 = vld [vmem:[#allocation8 + $0x36c] ss:$16 sps:$4 sm:$0xff]  }
 0x10d   :  { %2538 = vmatprep.subr.bf16.mxu1 %v5294_v1  ;;  %v5387_v1 = vld [vmem:[#allocation8 + $0x56c] ss:$16 sps:$4 sm:$0xff]  }
 0x10f   :  { %2496 = vmatpush2.bf16.msra.mxu0 %v5289_v2  ;;  %v5382_v2 = vld [vmem:[#allocation8 + $0x368] ss:$16 sps:$4 sm:$0xff]  }
 0x110   :  { %2539 = vmatpush2.bf16.msra.mxu1 %v5292_v3  ;;  %2497 = vmatprep.subr.bf16.mxu0 %v5297_v5  ;;  %v5385_v3 = vld [vmem:[#allocation8 + $0x568] ss:$16 sps:$4 sm:$0xff]   ;;  %v5390_v5 = vld [vmem:[#allocation8 + $0x34c] ss:$16 sps:$4 sm:$0xff]  }
 0x111   :  { %2540 = vmatprep.subr.bf16.mxu1 %v5300_v6  ;;  %v5393_v6 = vld [vmem:[#allocation8 + $0x54c] ss:$16 sps:$4 sm:$0xff]  }
 0x113   :  { %2498 = vmatpush2.bf16.msra.mxu0 %v5295_v7  ;;  %v5388_v7 = vld [vmem:[#allocation8 + $0x348] ss:$16 sps:$4 sm:$0xff]  }
 0x114   :  { %2541 = vmatpush2.bf16.msra.mxu1 %v5298_v8  ;;  %2499 = vmatprep.subr.bf16.mxu0 %v5303_v9  ;;  %v5391_v8 = vld [vmem:[#allocation8 + $0x548] ss:$16 sps:$4 sm:$0xff]   ;;  %v5396_v9 = vld [vmem:[#allocation8 + $0x32c] ss:$16 sps:$4 sm:$0xff]  }
 0x115   :  { %2542 = vmatprep.subr.bf16.mxu1 %v5306_v11  ;;  %v5399_v11 = vld [vmem:[#allocation8 + $0x52c] ss:$16 sps:$4 sm:$0xff]  }
 0x117   :  { %2500 = vmatpush2.bf16.msra.mxu0 %v5301_v12  ;;  %v5394_v12 = vld [vmem:[#allocation8 + $0x328] ss:$16 sps:$4 sm:$0xff]  }
 0x118   :  { %2543 = vmatpush2.bf16.msra.mxu1 %v5304_v13  ;;  %2555 = vmatprep.subr.bf16.mxu0 %v5312_v14  ;;  %v5397_v13 = vld [vmem:[#allocation8 + $0x528] ss:$16 sps:$4 sm:$0xff]   ;;  %v5402_v14 = vld [vmem:[#allocation8 + $0x30c] ss:$16 sps:$4 sm:$0xff]  }
 0x119   :  { %2598 = vmatprep.subr.bf16.mxu1 %v5315_v15  ;;  %v5405_v15 = vld [vmem:[#allocation8 + $0x50c] ss:$16 sps:$4 sm:$0xff]  }
 0x11a   :  { %2502 = vmatmul.mubr.bf16.vlgmr.msra.gmra.mxu0 %v6106_v16 }
 0x11b   :  { %2545 = vmatmul.mubr.bf16.vlgmr.msra.gmra.mxu1 %v6093_v4  ;;  %2556 = vmatpush1.bf16.msra.mxu0 %v5310_v17  ;;  %v5333_v4 = vld [vmem:[#allocation8 + $0x48c] ss:$16 sps:$4 sm:$0xff]   ;;  %v5400_v17 = vld [vmem:[#allocation8 + $0x308] ss:$16 sps:$4 sm:$0xff]  }
 0x11c   :  { %2599 = vmatpush1.bf16.msra.mxu1 %v5313_v18  ;;  %2557 = vmatprep.subr.bf16.mxu0 %v5318_v19  ;;  %v5403_v18 = vld [vmem:[#allocation8 + $0x508] ss:$16 sps:$4 sm:$0xff]   ;;  %v5408_v19 = vld [vmem:[#allocation8 + $0x6ec] ss:$16 sps:$4 sm:$0xff]  }
 0x11d   :  { %2600 = vmatprep.subr.bf16.mxu1 %v5321_v21  ;;  %2587 = vmatprep.mubr.bf16.mxu0 %v5831_v26  ;;  %v5411_v21 = vld [vmem:[#allocation8 + $0x8ec] ss:$16 sps:$4 sm:$0xff]   ;;  %v5832_v26 = vld [vmem:[#allocation5 + $0x8] ss:$40 sps:$4 sm:$0xff]  }
 0x11e   :  { %2630 = vmatprep.mubr.bf16.mxu1 %v6096_v34  ;;  %v5342_v34 = vld [vmem:[#allocation8 + $0x24c] ss:$16 sps:$4 sm:$0xff]  }
 0x11f   :  { %2558 = vmatpush1.bf16.msra.mxu0 %v5316_v22  ;;  %v5406_v22 = vld [vmem:[#allocation8 + $0x6e8] ss:$16 sps:$4 sm:$0xff]  }
 0x120   :  { %2601 = vmatpush1.bf16.msra.mxu1 %v5319_v23  ;;  %2559 = vmatprep.subr.bf16.mxu0 %v5324_v24  ;;  %v5409_v23 = vld [vmem:[#allocation8 + $0x8e8] ss:$16 sps:$4 sm:$0xff]   ;;  %v5414_v24 = vld [vmem:[#allocation8 + $0x6cc] ss:$16 sps:$4 sm:$0xff]  }
 0x121   :  { %2602 = vmatprep.subr.bf16.mxu1 %v5327_v25  ;;  %v5417_v25 = vld [vmem:[#allocation8 + $0x8cc] ss:$16 sps:$4 sm:$0xff]  }
 0x123   :  { %2560 = vmatpush1.bf16.msra.mxu0 %v5322_v27  ;;  %v5412_v27 = vld [vmem:[#allocation8 + $0x6c8] ss:$16 sps:$4 sm:$0xff]  }
 0x124   :  { %2603 = vmatpush1.bf16.msra.mxu1 %v5325_v28  ;;  %2561 = vmatprep.subr.bf16.mxu0 %v5330_v29  ;;  %v5415_v28 = vld [vmem:[#allocation8 + $0x8c8] ss:$16 sps:$4 sm:$0xff]   ;;  %v5420_v29 = vld [vmem:[#allocation8 + $0x6ac] ss:$16 sps:$4 sm:$0xff]  }
 0x125   :  { %2604 = vmatprep.subr.bf16.mxu1 %v5333_v4  ;;  %v5423_v4 = vld [vmem:[#allocation8 + $0x8ac] ss:$16 sps:$4 sm:$0xff]  }
 0x127   :  { %2562 = vmatpush1.bf16.msra.mxu0 %v5328_v49  ;;  %v5833_v49 = vld [vmem:[#allocation5 + $0x1c] ss:$40 sps:$4 sm:$0xff]  }
 0x128   :  { %2605 = vmatpush1.bf16.msra.mxu1 %v5331_v30  ;;  %2563 = vmatprep.subr.bf16.mxu0 %v5336_v31  ;;  %v5418_v30 = vld [vmem:[#allocation8 + $0x6a8] ss:$16 sps:$4 sm:$0xff]  }
 0x129   :  { %2606 = vmatprep.subr.bf16.mxu1 %v5339_v32  ;;  %v5421_v31 = vld [vmem:[#allocation8 + $0x8a8] ss:$16 sps:$4 sm:$0xff]   ;;  %v5426_v32 = vld [vmem:[#allocation8 + $0x68c] ss:$16 sps:$4 sm:$0xff]  }
 0x12b   :  { %2564 = vmatpush1.bf16.msra.mxu0 %v5334_v33  ;;  %v5424_v33 = vld [vmem:[#allocation8 + $0x688] ss:$16 sps:$4 sm:$0xff]  }
 0x12c   :  { %2607 = vmatpush1.bf16.msra.mxu1 %v5337_v35  ;;  %2565 = vmatprep.subr.bf16.mxu0 %v5342_v34  ;;  %v5427_v35 = vld [vmem:[#allocation8 + $0x888] ss:$16 sps:$4 sm:$0xff]   ;;  %v5432_v34 = vld [vmem:[#allocation8 + $0x66c] ss:$16 sps:$4 sm:$0xff]  }
 0x12d   :  { %2608 = vmatprep.subr.bf16.mxu1 %v5345_v36  ;;  %v5435_v36 = vld [vmem:[#allocation8 + $0x86c] ss:$16 sps:$4 sm:$0xff]  }
 0x12f   :  { %2566 = vmatpush1.bf16.msra.mxu0 %v5340_v37  ;;  %v5430_v37 = vld [vmem:[#allocation8 + $0x668] ss:$16 sps:$4 sm:$0xff]  }
 0x130   :  { %2609 = vmatpush1.bf16.msra.mxu1 %v5343_v38  ;;  %2567 = vmatprep.subr.bf16.mxu0 %v5348_v39  ;;  %v5433_v38 = vld [vmem:[#allocation8 + $0x868] ss:$16 sps:$4 sm:$0xff]   ;;  %v5441_v39 = vld [vmem:[#allocation8 + $0x84c] ss:$16 sps:$4 sm:$0xff]  }
 0x131   :  { %2610 = vmatprep.subr.bf16.mxu1 %v5351_v40  ;;  %v5436_v40 = vld [vmem:[#allocation8 + $0x648] ss:$16 sps:$4 sm:$0xff]  }
 0x133   :  { %2568 = vmatpush1.bf16.msra.mxu0 %v5346_v41  ;;  %v5439_v41 = vld [vmem:[#allocation8 + $0x848] ss:$16 sps:$4 sm:$0xff]  }
 0x134   :  { %2611 = vmatpush1.bf16.msra.mxu1 %v5349_v42  ;;  %2569 = vmatprep.subr.bf16.mxu0 %v5354_v43  ;;  %v5444_v42 = vld [vmem:[#allocation8 + $0x62c] ss:$16 sps:$4 sm:$0xff]  }
 0x135   :  { %2612 = vmatprep.subr.bf16.mxu1 %v5357_v44  ;;  %v5447_v43 = vld [vmem:[#allocation8 + $0x82c] ss:$16 sps:$4 sm:$0xff]   ;;  %v5442_v44 = vld [vmem:[#allocation8 + $0x628] ss:$16 sps:$4 sm:$0xff]  }
 0x137   :  { %2570 = vmatpush1.bf16.msra.mxu0 %v5352_v45  ;;  %v5445_v45 = vld [vmem:[#allocation8 + $0x828] ss:$16 sps:$4 sm:$0xff]  }
 0x138   :  { %2613 = vmatpush1.bf16.msra.mxu1 %v5355_v46  ;;  %2571 = vmatprep.subr.bf16.mxu0 %v5360_v47  ;;  %v5450_v46 = vld [vmem:[#allocation8 + $0x60c] ss:$16 sps:$4 sm:$0xff]  }
 0x139   :  { %2614 = vmatprep.subr.bf16.mxu1 %v5363_v48  ;;  %v5453_v47 = vld [vmem:[#allocation8 + $0x80c] ss:$16 sps:$4 sm:$0xff]   ;;  %v5448_v48 = vld [vmem:[#allocation8 + $0x608] ss:$16 sps:$4 sm:$0xff]  }
 0x13b   :  { %2572 = vmatpush2.bf16.msra.mxu0 %v5358_v50  ;;  %v5451_v50 = vld [vmem:[#allocation8 + $0x808] ss:$16 sps:$4 sm:$0xff]  }
 0x13c   :  { %2615 = vmatpush2.bf16.msra.mxu1 %v5361_v51  ;;  %2573 = vmatprep.subr.bf16.mxu0 %v5366_v52  ;;  %v5456_v51 = vld [vmem:[#allocation8 + $0x7ec] ss:$16 sps:$4 sm:$0xff]  }
 0x13d   :  { %2616 = vmatprep.subr.bf16.mxu1 %v5369_v53  ;;  %v5459_v52 = vld [vmem:[#allocation8 + $0x9ec] ss:$16 sps:$4 sm:$0xff]   ;;  %v5454_v53 = vld [vmem:[#allocation8 + $0x7e8] ss:$16 sps:$4 sm:$0xff]  }
 0x13f   :  { %2574 = vmatpush2.bf16.msra.mxu0 %v5364_v54  ;;  %v5457_v54 = vld [vmem:[#allocation8 + $0x9e8] ss:$16 sps:$4 sm:$0xff]  }
 0x140   :  { %2617 = vmatpush2.bf16.msra.mxu1 %v5367_v55  ;;  %2575 = vmatprep.subr.bf16.mxu0 %v5372_v56  ;;  %v5462_v55 = vld [vmem:[#allocation8 + $0x7cc] ss:$16 sps:$4 sm:$0xff]  }
 0x141   :  { %2618 = vmatprep.subr.bf16.mxu1 %v5375_v57  ;;  %v5465_v56 = vld [vmem:[#allocation8 + $0x9cc] ss:$16 sps:$4 sm:$0xff]   ;;  %v5460_v57 = vld [vmem:[#allocation8 + $0x7c8] ss:$16 sps:$4 sm:$0xff]  }
 0x143   :  { %2576 = vmatpush2.bf16.msra.mxu0 %v5370_v58  ;;  %v5463_v58 = vld [vmem:[#allocation8 + $0x9c8] ss:$16 sps:$4 sm:$0xff]  }
 0x144   :  { %2619 = vmatpush2.bf16.msra.mxu1 %v5373_v59  ;;  %2577 = vmatprep.subr.bf16.mxu0 %v5378_v60  ;;  %v5468_v59 = vld [vmem:[#allocation8 + $0x7ac] ss:$16 sps:$4 sm:$0xff]  }
 0x145   :  { %2620 = vmatprep.subr.bf16.mxu1 %v5381_v61  ;;  %v5471_v60 = vld [vmem:[#allocation8 + $0x9ac] ss:$16 sps:$4 sm:$0xff]   ;;  %v5466_v61 = vld [vmem:[#allocation8 + $0x7a8] ss:$16 sps:$4 sm:$0xff]  }
 0x147   :  { %2578 = vmatpush2.bf16.msra.mxu0 %v5376_v62  ;;  %v5469_v62 = vld [vmem:[#allocation8 + $0x9a8] ss:$16 sps:$4 sm:$0xff]  }
 0x148   :  { %2621 = vmatpush2.bf16.msra.mxu1 %v5379_v63  ;;  %2579 = vmatprep.subr.bf16.mxu0 %v5384_v0  ;;  %v5474_v63 = vld [vmem:[#allocation8 + $0x78c] ss:$16 sps:$4 sm:$0xff]  }
 0x149   :  { %2622 = vmatprep.subr.bf16.mxu1 %v5387_v1  ;;  %v5477_v0 = vld [vmem:[#allocation8 + $0x98c] ss:$16 sps:$4 sm:$0xff]   ;;  %v5472_v1 = vld [vmem:[#allocation8 + $0x788] ss:$16 sps:$4 sm:$0xff]  }
 0x14b   :  { %2580 = vmatpush2.bf16.msra.mxu0 %v5382_v2  ;;  %v5475_v2 = vld [vmem:[#allocation8 + $0x988] ss:$16 sps:$4 sm:$0xff]  }
 0x14c   :  { %2623 = vmatpush2.bf16.msra.mxu1 %v5385_v3  ;;  %2581 = vmatprep.subr.bf16.mxu0 %v5390_v5  ;;  %v5480_v3 = vld [vmem:[#allocation8 + $0x76c] ss:$16 sps:$4 sm:$0xff]  }
 0x14d   :  { %2624 = vmatprep.subr.bf16.mxu1 %v5393_v6  ;;  %v5483_v5 = vld [vmem:[#allocation8 + $0x96c] ss:$16 sps:$4 sm:$0xff]   ;;  %v5478_v6 = vld [vmem:[#allocation8 + $0x768] ss:$16 sps:$4 sm:$0xff]  }
 0x14f   :  { %2582 = vmatpush2.bf16.msra.mxu0 %v5388_v7  ;;  %v5481_v7 = vld [vmem:[#allocation8 + $0x968] ss:$16 sps:$4 sm:$0xff]  }
 0x150   :  { %2625 = vmatpush2.bf16.msra.mxu1 %v5391_v8  ;;  %2583 = vmatprep.subr.bf16.mxu0 %v5396_v9  ;;  %v5486_v8 = vld [vmem:[#allocation8 + $0x74c] ss:$16 sps:$4 sm:$0xff]  }
 0x151   :  { %2626 = vmatprep.subr.bf16.mxu1 %v5399_v11  ;;  %v5489_v9 = vld [vmem:[#allocation8 + $0x94c] ss:$16 sps:$4 sm:$0xff]   ;;  %v5484_v11 = vld [vmem:[#allocation8 + $0x748] ss:$16 sps:$4 sm:$0xff]  }
 0x153   :  { %2584 = vmatpush2.bf16.msra.mxu0 %v5394_v12  ;;  %v5487_v12 = vld [vmem:[#allocation8 + $0x948] ss:$16 sps:$4 sm:$0xff]  }
 0x154   :  { %2627 = vmatpush2.bf16.msra.mxu1 %v5397_v13  ;;  %2585 = vmatprep.subr.bf16.mxu0 %v5402_v14  ;;  %v5492_v13 = vld [vmem:[#allocation8 + $0x72c] ss:$16 sps:$4 sm:$0xff]  }
 0x155   :  { %2628 = vmatprep.subr.bf16.mxu1 %v5405_v15  ;;  %v5495_v14 = vld [vmem:[#allocation8 + $0x92c] ss:$16 sps:$4 sm:$0xff]   ;;  %v5490_v15 = vld [vmem:[#allocation8 + $0x728] ss:$16 sps:$4 sm:$0xff]  }
 0x157   :  { %2586 = vmatpush2.bf16.msra.mxu0 %v5400_v17  ;;  %v5493_v17 = vld [vmem:[#allocation8 + $0x928] ss:$16 sps:$4 sm:$0xff]  }
 0x158   :  { %2629 = vmatpush2.bf16.msra.mxu1 %v5403_v18  ;;  %2641 = vmatprep.subr.bf16.mxu0 %v5408_v19  ;;  %v5498_v18 = vld [vmem:[#allocation8 + $0x70c] ss:$16 sps:$4 sm:$0xff]  }
 0x159   :  { %2684 = vmatprep.subr.bf16.mxu1 %v5411_v21  ;;  %v5501_v19 = vld [vmem:[#allocation8 + $0x90c] ss:$16 sps:$4 sm:$0xff]   ;;  %v5496_v21 = vld [vmem:[#allocation8 + $0x708] ss:$16 sps:$4 sm:$0xff]  }
 0x15a   :  { %2588 = vmatmul.mubr.bf16.vlgmr.msra.gmra.mxu0 %v5832_v26  ;;  %v5505_v26 = vld [vmem:[#allocation7 + $0x2e0] ss:$16 sps:$4 sm:$0xff]  }
 0x15b   :  { %2631 = vmatmul.mubr.bf16.vlgmr.msra.gmra.mxu1 %v6099_v10  ;;  %2642 = vmatpush1.bf16.msra.mxu0 %v5406_v22  ;;  %v5429_v10 = vld [vmem:[#allocation8 + $0x88c] ss:$16 sps:$4 sm:$0xff]   ;;  %v5499_v22 = vld [vmem:[#allocation8 + $0x908] ss:$16 sps:$4 sm:$0xff]  }
 0x15c   :  { %2685 = vmatpush1.bf16.msra.mxu1 %v5409_v23  ;;  %2643 = vmatprep.subr.bf16.mxu0 %v5414_v24  ;;  %v5504_v23 = vld [vmem:[#allocation7 + $0xe4] ss:$16 sps:$4 sm:$0xff]  }
 0x15d   :  { %2686 = vmatprep.subr.bf16.mxu1 %v5417_v25  ;;  %2673 = vmatprep.mubr.bf16.mxu0 %v5833_v49  ;;  %v5507_v24 = vld [vmem:[#allocation7 + $0x2e4] ss:$16 sps:$4 sm:$0xff]   ;;  %v5502_v25 = vld [vmem:[#allocation7 + $0xe0] ss:$16 sps:$4 sm:$0xff]  }
 0x15e   :  { %2716 = vmatprep.mubr.bf16.mxu1 %v6102_v20  ;;  %v5438_v20 = vld [vmem:[#allocation8 + $0x64c] ss:$16 sps:$4 sm:$0xff]  }
 0x15f   :  { %2644 = vmatpush1.bf16.msra.mxu0 %v5412_v27  ;;  %v5510_v27 = vld [vmem:[#allocation7 + $0xc4] ss:$16 sps:$4 sm:$0xff]  }
 0x160   :  { %2687 = vmatpush1.bf16.msra.mxu1 %v5415_v28  ;;  %2645 = vmatprep.subr.bf16.mxu0 %v5420_v29  ;;  %v5513_v28 = vld [vmem:[#allocation7 + $0x2c4] ss:$16 sps:$4 sm:$0xff]   ;;  %v5508_v29 = vld [vmem:[#allocation7 + $0xc0] ss:$16 sps:$4 sm:$0xff]  }
 0x161   :  { %2688 = vmatprep.subr.bf16.mxu1 %v5423_v4  ;;  %v5511_v4 = vld [vmem:[#allocation7 + $0x2c0] ss:$16 sps:$4 sm:$0xff]   ;;  %v6113_v49 = vld [vmem:[#allocation2 + $0x4] ss:$24 sps:$4 sm:$0xff]  }
 0x163   :  { %2646 = vmatpush1.bf16.msra.mxu0 %v5418_v30  ;;  %v6115_v30 = vld [vmem:[#allocation2 + $0xc] ss:$24 sps:$4 sm:$0xff]  }
 0x164   :  { %2689 = vmatpush1.bf16.msra.mxu1 %v5421_v31  ;;  %2647 = vmatprep.subr.bf16.mxu0 %v5426_v32  ;;  %v5834_v31 = vld [vmem:[#allocation5 + $0x18] ss:$40 sps:$4 sm:$0xff]   ;;  %v5516_v32 = vld [vmem:[#allocation7 + $0xa4] ss:$16 sps:$4 sm:$0xff]  }
 0x165   :  { %2690 = vmatprep.subr.bf16.mxu1 %v5429_v10  ;;  %v5519_v10 = vld [vmem:[#allocation7 + $0x2a4] ss:$16 sps:$4 sm:$0xff]  }
 0x167   :  { %2648 = vmatpush1.bf16.msra.mxu0 %v5424_v33  ;;  %v5514_v33 = vld [vmem:[#allocation7 + $0xa0] ss:$16 sps:$4 sm:$0xff]  }
 0x168   :  { %2691 = vmatpush1.bf16.msra.mxu1 %v5427_v35  ;;  %2649 = vmatprep.subr.bf16.mxu0 %v5432_v34  ;;  %v5517_v35 = vld [vmem:[#allocation7 + $0x2a0] ss:$16 sps:$4 sm:$0xff]   ;;  %v5522_v34 = vld [vmem:[#allocation7 + $0x84] ss:$16 sps:$4 sm:$0xff]  }
 0x169   :  { %2692 = vmatprep.subr.bf16.mxu1 %v5435_v36  ;;  %v5525_v36 = vld [vmem:[#allocation7 + $0x284] ss:$16 sps:$4 sm:$0xff]  }
 0x16b   :  { %2650 = vmatpush1.bf16.msra.mxu0 %v5430_v37  ;;  %v5523_v37 = vld [vmem:[#allocation7 + $0x280] ss:$16 sps:$4 sm:$0xff]  }
 0x16c   :  { %2693 = vmatpush1.bf16.msra.mxu1 %v5433_v38  ;;  %2651 = vmatprep.subr.bf16.mxu0 %v5438_v20  ;;  %v5528_v38 = vld [vmem:[#allocation7 + $0x64] ss:$16 sps:$4 sm:$0xff]  }
 0x16d   :  { %2694 = vmatprep.subr.bf16.mxu1 %v5441_v39  ;;  %v5531_v20 = vld [vmem:[#allocation7 + $0x264] ss:$16 sps:$4 sm:$0xff]   ;;  %v5526_v39 = vld [vmem:[#allocation7 + $0x60] ss:$16 sps:$4 sm:$0xff]  }
 0x16f   :  { %2652 = vmatpush1.bf16.msra.mxu0 %v5436_v40  ;;  %v5529_v40 = vld [vmem:[#allocation7 + $0x260] ss:$16 sps:$4 sm:$0xff]  }
 0x170   :  { %2695 = vmatpush1.bf16.msra.mxu1 %v5439_v41  ;;  %2653 = vmatprep.subr.bf16.mxu0 %v5444_v42  ;;  %v5534_v41 = vld [vmem:[#allocation7 + $0x44] ss:$16 sps:$4 sm:$0xff]  }
 0x171   :  { %2696 = vmatprep.subr.bf16.mxu1 %v5447_v43  ;;  %v5537_v42 = vld [vmem:[#allocation7 + $0x244] ss:$16 sps:$4 sm:$0xff]   ;;  %v5532_v43 = vld [vmem:[#allocation7 + $0x40] ss:$16 sps:$4 sm:$0xff]  }
 0x173   :  { %2654 = vmatpush1.bf16.msra.mxu0 %v5442_v44  ;;  %v5535_v44 = vld [vmem:[#allocation7 + $0x240] ss:$16 sps:$4 sm:$0xff]  }
 0x174   :  { %2697 = vmatpush1.bf16.msra.mxu1 %v5445_v45  ;;  %2655 = vmatprep.subr.bf16.mxu0 %v5450_v46  ;;  %v5540_v45 = vld [vmem:[#allocation7 + $0x24] ss:$16 sps:$4 sm:$0xff]  }
 0x175   :  { %2698 = vmatprep.subr.bf16.mxu1 %v5453_v47  ;;  %v5543_v46 = vld [vmem:[#allocation7 + $0x224] ss:$16 sps:$4 sm:$0xff]   ;;  %v5538_v47 = vld [vmem:[#allocation7 + $0x20] ss:$16 sps:$4 sm:$0xff]  }
 0x177   :  { %2656 = vmatpush1.bf16.msra.mxu0 %v5448_v48  ;;  %v5541_v48 = vld [vmem:[#allocation7 + $0x220] ss:$16 sps:$4 sm:$0xff]  }
 0x178   :  { %2699 = vmatpush1.bf16.msra.mxu1 %v5451_v50  ;;  %2657 = vmatprep.subr.bf16.mxu0 %v5456_v51  ;;  %v5546_v50 = vld [vmem:[#allocation7 + $0x4] ss:$16 sps:$4 sm:$0xff]  }
 0x179   :  { %2700 = vmatprep.subr.bf16.mxu1 %v5459_v52  ;;  %v5549_v51 = vld [vmem:[#allocation7 + $0x204] ss:$16 sps:$4 sm:$0xff]   ;;  %v5544_v52 = vld [vmem:[#allocation7] ss:$16 sps:$4 sm:$0xff]  }
 0x17b   :  { %2658 = vmatpush2.bf16.msra.mxu0 %v5454_v53  ;;  %v5547_v53 = vld [vmem:[#allocation7 + $0x200] ss:$16 sps:$4 sm:$0xff]  }
 0x17c   :  { %2701 = vmatpush2.bf16.msra.mxu1 %v5457_v54  ;;  %2659 = vmatprep.subr.bf16.mxu0 %v5462_v55  ;;  %v5552_v54 = vld [vmem:[#allocation7 + $0x1e4] ss:$16 sps:$4 sm:$0xff]  }
 0x17d   :  { %2702 = vmatprep.subr.bf16.mxu1 %v5465_v56  ;;  %v5555_v55 = vld [vmem:[#allocation7 + $0x3e4] ss:$16 sps:$4 sm:$0xff]   ;;  %v5550_v56 = vld [vmem:[#allocation7 + $0x1e0] ss:$16 sps:$4 sm:$0xff]  }
 0x17f   :  { %2660 = vmatpush2.bf16.msra.mxu0 %v5460_v57  ;;  %v5553_v57 = vld [vmem:[#allocation7 + $0x3e0] ss:$16 sps:$4 sm:$0xff]  }
 0x180   :  { %2703 = vmatpush2.bf16.msra.mxu1 %v5463_v58  ;;  %2661 = vmatprep.subr.bf16.mxu0 %v5468_v59  ;;  %v5558_v58 = vld [vmem:[#allocation7 + $0x1c4] ss:$16 sps:$4 sm:$0xff]  }
 0x181   :  { %2704 = vmatprep.subr.bf16.mxu1 %v5471_v60  ;;  %v5561_v59 = vld [vmem:[#allocation7 + $0x3c4] ss:$16 sps:$4 sm:$0xff]   ;;  %v5556_v60 = vld [vmem:[#allocation7 + $0x1c0] ss:$16 sps:$4 sm:$0xff]  }
 0x183   :  { %2662 = vmatpush2.bf16.msra.mxu0 %v5466_v61  ;;  %v5559_v61 = vld [vmem:[#allocation7 + $0x3c0] ss:$16 sps:$4 sm:$0xff]  }
 0x184   :  { %2705 = vmatpush2.bf16.msra.mxu1 %v5469_v62  ;;  %2663 = vmatprep.subr.bf16.mxu0 %v5474_v63  ;;  %v5564_v62 = vld [vmem:[#allocation7 + $0x1a4] ss:$16 sps:$4 sm:$0xff]  }
 0x185   :  { %2706 = vmatprep.subr.bf16.mxu1 %v5477_v0  ;;  %v5567_v63 = vld [vmem:[#allocation7 + $0x3a4] ss:$16 sps:$4 sm:$0xff]   ;;  %v5562_v0 = vld [vmem:[#allocation7 + $0x1a0] ss:$16 sps:$4 sm:$0xff]  }
 0x187   :  { %2664 = vmatpush2.bf16.msra.mxu0 %v5472_v1  ;;  %v5565_v1 = vld [vmem:[#allocation7 + $0x3a0] ss:$16 sps:$4 sm:$0xff]  }
 0x188   :  { %2707 = vmatpush2.bf16.msra.mxu1 %v5475_v2  ;;  %2665 = vmatprep.subr.bf16.mxu0 %v5480_v3  ;;  %v5570_v2 = vld [vmem:[#allocation7 + $0x184] ss:$16 sps:$4 sm:$0xff]  }
 0x189   :  { %2708 = vmatprep.subr.bf16.mxu1 %v5483_v5  ;;  %v5573_v3 = vld [vmem:[#allocation7 + $0x384] ss:$16 sps:$4 sm:$0xff]   ;;  %v5568_v5 = vld [vmem:[#allocation7 + $0x180] ss:$16 sps:$4 sm:$0xff]  }
 0x18b   :  { %2666 = vmatpush2.bf16.msra.mxu0 %v5478_v6  ;;  %v5571_v6 = vld [vmem:[#allocation7 + $0x380] ss:$16 sps:$4 sm:$0xff]  }
 0x18c   :  { %2709 = vmatpush2.bf16.msra.mxu1 %v5481_v7  ;;  %2667 = vmatprep.subr.bf16.mxu0 %v5486_v8  ;;  %v5576_v7 = vld [vmem:[#allocation7 + $0x164] ss:$16 sps:$4 sm:$0xff]  }
 0x18d   :  { %2710 = vmatprep.subr.bf16.mxu1 %v5489_v9  ;;  %v5579_v8 = vld [vmem:[#allocation7 + $0x364] ss:$16 sps:$4 sm:$0xff]   ;;  %v5574_v9 = vld [vmem:[#allocation7 + $0x160] ss:$16 sps:$4 sm:$0xff]  }
 0x18f   :  { %2668 = vmatpush2.bf16.msra.mxu0 %v5484_v11  ;;  %v5577_v11 = vld [vmem:[#allocation7 + $0x360] ss:$16 sps:$4 sm:$0xff]  }
 0x190   :  { %2711 = vmatpush2.bf16.msra.mxu1 %v5487_v12  ;;  %2669 = vmatprep.subr.bf16.mxu0 %v5492_v13  ;;  %v5582_v12 = vld [vmem:[#allocation7 + $0x144] ss:$16 sps:$4 sm:$0xff]  }
 0x191   :  { %2712 = vmatprep.subr.bf16.mxu1 %v5495_v14  ;;  %v5585_v13 = vld [vmem:[#allocation7 + $0x344] ss:$16 sps:$4 sm:$0xff]   ;;  %v5580_v14 = vld [vmem:[#allocation7 + $0x140] ss:$16 sps:$4 sm:$0xff]  }
 0x193   :  { %2670 = vmatpush2.bf16.msra.mxu0 %v5490_v15  ;;  %v5583_v15 = vld [vmem:[#allocation7 + $0x340] ss:$16 sps:$4 sm:$0xff]  }
 0x194   :  { %2713 = vmatpush2.bf16.msra.mxu1 %v5493_v17  ;;  %2671 = vmatprep.subr.bf16.mxu0 %v5498_v18  ;;  %v5588_v17 = vld [vmem:[#allocation7 + $0x124] ss:$16 sps:$4 sm:$0xff]  }
 0x195   :  { %2714 = vmatprep.subr.bf16.mxu1 %v5501_v19  ;;  %v5591_v18 = vld [vmem:[#allocation7 + $0x324] ss:$16 sps:$4 sm:$0xff]   ;;  %v5586_v19 = vld [vmem:[#allocation7 + $0x120] ss:$16 sps:$4 sm:$0xff]  }
 0x197   :  { %2672 = vmatpush2.bf16.msra.mxu0 %v5496_v21  ;;  %v5589_v21 = vld [vmem:[#allocation7 + $0x320] ss:$16 sps:$4 sm:$0xff]  }
 0x198   :  { %2715 = vmatpush2.bf16.msra.mxu1 %v5499_v22  ;;  %3717 = vmatprep.subr.bf16.mxu0 %v5504_v23  ;;  %v5594_v22 = vld [vmem:[#allocation7 + $0x104] ss:$16 sps:$4 sm:$0xff]  }
 0x199   :  { %3760 = vmatprep.subr.bf16.mxu1 %v5507_v24  ;;  %v5597_v23 = vld [vmem:[#allocation7 + $0x304] ss:$16 sps:$4 sm:$0xff]   ;;  %v5592_v24 = vld [vmem:[#allocation7 + $0x100] ss:$16 sps:$4 sm:$0xff]  }
 0x19a   :  { %2674 = vmatmul.mubr.bf16.vlgmr.msra.gmra.mxu0 %v5834_v31  ;;  %v5607_v31 = vld [vmem:[#allocation7 + $0xe8] ss:$16 sps:$4 sm:$0xff]  }
 0x19b   :  { %2717 = vmatmul.mubr.bf16.vlgmr.msra.gmra.mxu1 %v6106_v16  ;;  %3718 = vmatpush1.bf16.msra.mxu0 %v5502_v25  ;;  %v5520_v16 = vld [vmem:[#allocation7 + $0x80] ss:$16 sps:$4 sm:$0xff]  }
 0x19c   :  { %3761 = vmatpush1.bf16.msra.mxu1 %v5505_v26  ;;  %3719 = vmatprep.subr.bf16.mxu0 %v5510_v27  ;;  %v5595_v25 = vld [vmem:[#allocation7 + $0x300] ss:$16 sps:$4 sm:$0xff]   ;;  %v5606_v26 = vld [vmem:[#allocation7 + $0x4e4] ss:$16 sps:$4 sm:$0xff]   ;;  %v5609_v27 = vld [vmem:[#allocation7 + $0xec] ss:$16 sps:$4 sm:$0xff]  }
 0x19d   :  { %3762 = vmatprep.subr.bf16.mxu1 %v5513_v28  ;;  %3749 = vmatprep.mubr.bf16.mxu0 %v6113_v49  ;;  %v6120_v28 = vld [vmem:[#allocation2] ss:$24 sps:$4 sm:$0xff]  }
 0x19e   :  { %3792 = vmatprep.mubr.bf16.mxu1 %v6115_v30 }
 0x19f   :  { %3720 = vmatpush1.bf16.msra.mxu0 %v5508_v29  ;;  %v6122_v29 = vld [vmem:[#allocation2 + $0x8] ss:$24 sps:$4 sm:$0xff]  }
 0x1a0   :  { %3763 = vmatpush1.bf16.msra.mxu1 %v5511_v4  ;;  %3721 = vmatprep.subr.bf16.mxu0 %v5516_v32  ;;  %v5604_v4 = vld [vmem:[#allocation7 + $0x4e0] ss:$16 sps:$4 sm:$0xff]   ;;  %v5612_v32 = vld [vmem:[#allocation7 + $0x4c4] ss:$16 sps:$4 sm:$0xff]  }
 0x1a1   :  { %3764 = vmatprep.subr.bf16.mxu1 %v5519_v10  ;;  %v5615_v10 = vld [vmem:[#allocation7 + $0xcc] ss:$16 sps:$4 sm:$0xff]  }
 0x1a3   :  { %3722 = vmatpush1.bf16.msra.mxu0 %v5514_v33  ;;  %v6124_v33 = vld [vmem:[#allocation2 + $0x14] ss:$24 sps:$4 sm:$0xff]  }
 0x1a4   :  { %3765 = vmatpush1.bf16.msra.mxu1 %v5517_v35  ;;  %3723 = vmatprep.subr.bf16.mxu0 %v5522_v34  ;;  %v5610_v35 = vld [vmem:[#allocation7 + $0x4c0] ss:$16 sps:$4 sm:$0xff]   ;;  %v5613_v34 = vld [vmem:[#allocation7 + $0xc8] ss:$16 sps:$4 sm:$0xff]  }
 0x1a5   :  { %3766 = vmatprep.subr.bf16.mxu1 %v5525_v36  ;;  %v5618_v36 = vld [vmem:[#allocation7 + $0x4a4] ss:$16 sps:$4 sm:$0xff]  }
 0x1a7   :  { %3724 = vmatpush1.bf16.msra.mxu0 %v5520_v16  ;;  %v5621_v16 = vld [vmem:[#allocation7 + $0xac] ss:$16 sps:$4 sm:$0xff]  }
 0x1a8   :  { %3767 = vmatpush1.bf16.msra.mxu1 %v5523_v37  ;;  %3725 = vmatprep.subr.bf16.mxu0 %v5528_v38  ;;  %v5616_v37 = vld [vmem:[#allocation7 + $0x4a0] ss:$16 sps:$4 sm:$0xff]   ;;  %v5619_v38 = vld [vmem:[#allocation7 + $0xa8] ss:$16 sps:$4 sm:$0xff]  }
 0x1a9   :  { %3768 = vmatprep.subr.bf16.mxu1 %v5531_v20  ;;  %v5624_v20 = vld [vmem:[#allocation7 + $0x484] ss:$16 sps:$4 sm:$0xff]  }
 0x1ab   :  { %3726 = vmatpush1.bf16.msra.mxu0 %v5526_v39  ;;  %v5627_v39 = vld [vmem:[#allocation7 + $0x8c] ss:$16 sps:$4 sm:$0xff]  }
 0x1ac   :  { %3769 = vmatpush1.bf16.msra.mxu1 %v5529_v40  ;;  %3727 = vmatprep.subr.bf16.mxu0 %v5534_v41  ;;  %v5622_v40 = vld [vmem:[#allocation7 + $0x480] ss:$16 sps:$4 sm:$0xff]   ;;  %v5625_v41 = vld [vmem:[#allocation7 + $0x88] ss:$16 sps:$4 sm:$0xff]  }
 0x1ad   :  { %3770 = vmatprep.subr.bf16.mxu1 %v5537_v42  ;;  %v5630_v42 = vld [vmem:[#allocation7 + $0x464] ss:$16 sps:$4 sm:$0xff]  }
 0x1af   :  { %3728 = vmatpush1.bf16.msra.mxu0 %v5532_v43  ;;  %v5633_v43 = vld [vmem:[#allocation7 + $0x6c] ss:$16 sps:$4 sm:$0xff]  }
 0x1b0   :  { %3771 = vmatpush1.bf16.msra.mxu1 %v5535_v44  ;;  %3729 = vmatprep.subr.bf16.mxu0 %v5540_v45  ;;  %v5628_v44 = vld [vmem:[#allocation7 + $0x460] ss:$16 sps:$4 sm:$0xff]   ;;  %v5636_v45 = vld [vmem:[#allocation7 + $0x444] ss:$16 sps:$4 sm:$0xff]  }
 0x1b1   :  { %3772 = vmatprep.subr.bf16.mxu1 %v5543_v46  ;;  %v5639_v46 = vld [vmem:[#allocation7 + $0x4c] ss:$16 sps:$4 sm:$0xff]  }
 0x1b3   :  { %3730 = vmatpush1.bf16.msra.mxu0 %v5538_v47  ;;  %v5634_v47 = vld [vmem:[#allocation7 + $0x440] ss:$16 sps:$4 sm:$0xff]  }
 0x1b4   :  { %3773 = vmatpush1.bf16.msra.mxu1 %v5541_v48  ;;  %3731 = vmatprep.subr.bf16.mxu0 %v5546_v50  ;;  %v5637_v48 = vld [vmem:[#allocation7 + $0x48] ss:$16 sps:$4 sm:$0xff]   ;;  %v5642_v50 = vld [vmem:[#allocation7 + $0x424] ss:$16 sps:$4 sm:$0xff]  }
 0x1b5   :  { %3774 = vmatprep.subr.bf16.mxu1 %v5549_v51  ;;  %v5645_v51 = vld [vmem:[#allocation7 + $0x2c] ss:$16 sps:$4 sm:$0xff]  }
 0x1b7   :  { %3732 = vmatpush1.bf16.msra.mxu0 %v5544_v52  ;;  %v5640_v52 = vld [vmem:[#allocation7 + $0x420] ss:$16 sps:$4 sm:$0xff]  }
 0x1b8   :  { %3775 = vmatpush1.bf16.msra.mxu1 %v5547_v53  ;;  %3733 = vmatprep.subr.bf16.mxu0 %v5552_v54  ;;  %v5643_v53 = vld [vmem:[#allocation7 + $0x28] ss:$16 sps:$4 sm:$0xff]   ;;  %v6130_v54 = vpop.f32.mrf.mxu0 }
 0x1b9   :  { %3776 = vmatprep.subr.bf16.mxu1 %v5555_v55  ;;  %v6132_v55 = vpop.f32.mrf.mxu1 }
 0x1bb   :  { %3734 = vmatpush2.bf16.msra.mxu0 %v5550_v56  ;;  %v5648_v56 = vld [vmem:[#allocation7 + $0x404] ss:$16 sps:$4 sm:$0xff]  }
 0x1bc   :  { %3777 = vmatpush2.bf16.msra.mxu1 %v5553_v57  ;;  %3735 = vmatprep.subr.bf16.mxu0 %v5558_v58  ;;  %v5651_v57 = vld [vmem:[#allocation7 + $0xc] ss:$16 sps:$4 sm:$0xff]   ;;  %v5646_v58 = vld [vmem:[#allocation7 + $0x400] ss:$16 sps:$4 sm:$0xff]  }
 0x1bd   :  { %3778 = vmatprep.subr.bf16.mxu1 %v5561_v59  ;;  %v5649_v59 = vld [vmem:[#allocation7 + $0x8] ss:$16 sps:$4 sm:$0xff]  }
 0x1bf   :  { %3736 = vmatpush2.bf16.msra.mxu0 %v5556_v60  ;;  %v6134_v60 = vpop.f32.mrf.mxu0 }
 0x1c0   :  { %3779 = vmatpush2.bf16.msra.mxu1 %v5559_v61  ;;  %3737 = vmatprep.subr.bf16.mxu0 %v5564_v62  ;;  %v6136_v61 = vpop.f32.mrf.mxu1  ;;  %v5654_v62 = vld [vmem:[#allocation7 + $0x5e4] ss:$16 sps:$4 sm:$0xff]  }
 0x1c1   :  { %3780 = vmatprep.subr.bf16.mxu1 %v5567_v63  ;;  %v5657_v63 = vld [vmem:[#allocation7 + $0x1ec] ss:$16 sps:$4 sm:$0xff]  }
 0x1c3   :  { %3738 = vmatpush2.bf16.msra.mxu0 %v5562_v0  ;;  %v5652_v0 = vld [vmem:[#allocation7 + $0x5e0] ss:$16 sps:$4 sm:$0xff]  }
 0x1c4   :  { %3781 = vmatpush2.bf16.msra.mxu1 %v5565_v1  ;;  %3739 = vmatprep.subr.bf16.mxu0 %v5570_v2  ;;  %v5655_v1 = vld [vmem:[#allocation7 + $0x1e8] ss:$16 sps:$4 sm:$0xff]   ;;  %v6138_v2 = vpop.f32.mrf.mxu0 }
 0x1c5   :  { %3782 = vmatprep.subr.bf16.mxu1 %v5573_v3  ;;  %v6140_v3 = vpop.f32.mrf.mxu1 }
 0x1c7   :  { %3740 = vmatpush2.bf16.msra.mxu0 %v5568_v5  ;;  %v5660_v5 = vld [vmem:[#allocation7 + $0x5c4] ss:$16 sps:$4 sm:$0xff]  }
 0x1c8   :  { %3783 = vmatpush2.bf16.msra.mxu1 %v5571_v6  ;;  %3741 = vmatprep.subr.bf16.mxu0 %v5576_v7  ;;  %v5663_v6 = vld [vmem:[#allocation7 + $0x1cc] ss:$16 sps:$4 sm:$0xff]   ;;  %v5658_v7 = vld [vmem:[#allocation7 + $0x5c0] ss:$16 sps:$4 sm:$0xff]  }
 0x1c9   :  { %3784 = vmatprep.subr.bf16.mxu1 %v5579_v8  ;;  %v5661_v8 = vld [vmem:[#allocation7 + $0x1c8] ss:$16 sps:$4 sm:$0xff]  }
 0x1cb   :  { %3742 = vmatpush2.bf16.msra.mxu0 %v5574_v9  ;;  %v6142_v9 = vpop.f32.mrf.mxu0 }
 0x1cc   :  { %3785 = vmatpush2.bf16.msra.mxu1 %v5577_v11  ;;  %3743 = vmatprep.subr.bf16.mxu0 %v5582_v12  ;;  %v6144_v11 = vpop.f32.mrf.mxu1  ;;  %v5666_v12 = vld [vmem:[#allocation7 + $0x5a4] ss:$16 sps:$4 sm:$0xff]  }
 0x1cd   :  { %3786 = vmatprep.subr.bf16.mxu1 %v5585_v13  ;;  %v5669_v13 = vld [vmem:[#allocation7 + $0x1ac] ss:$16 sps:$4 sm:$0xff]  }
 0x1cf   :  { %3744 = vmatpush2.bf16.msra.mxu0 %v5580_v14  ;;  %v6146_v14 = vpop.f32.mrf.mxu0 }
 0x1d0   :  { %3787 = vmatpush2.bf16.msra.mxu1 %v5583_v15  ;;  %3745 = vmatprep.subr.bf16.mxu0 %v5588_v17  ;;  %v6148_v15 = vpop.f32.mrf.mxu1  ;;  %v5664_v17 = vld [vmem:[#allocation7 + $0x5a0] ss:$16 sps:$4 sm:$0xff]  }
 0x1d1   :  { %3788 = vmatprep.subr.bf16.mxu1 %v5591_v18  ;;  %v5667_v18 = vld [vmem:[#allocation7 + $0x1a8] ss:$16 sps:$4 sm:$0xff]  }
 0x1d3   :  { %3746 = vmatpush2.bf16.msra.mxu0 %v5586_v19  ;;  %v5672_v19 = vld [vmem:[#allocation7 + $0x584] ss:$16 sps:$4 sm:$0xff]  }
 0x1d4   :  { %3789 = vmatpush2.bf16.msra.mxu1 %v5589_v21  ;;  %3747 = vmatprep.subr.bf16.mxu0 %v5594_v22  ;;  %v5675_v21 = vld [vmem:[#allocation7 + $0x18c] ss:$16 sps:$4 sm:$0xff]   ;;  %v6150_v22 = vpop.f32.mrf.mxu0 }
 0x1d5   :  { %3790 = vmatprep.subr.bf16.mxu1 %v5597_v23  ;;  %v6152_v23 = vpop.f32.mrf.mxu1 }
 0x1d7   :  { %3748 = vmatpush2.bf16.msra.mxu0 %v5592_v24  ;;  %v5670_v24 = vld [vmem:[#allocation7 + $0x580] ss:$16 sps:$4 sm:$0xff]  }
 0x1d8   :  { %3791 = vmatpush2.bf16.msra.mxu1 %v5595_v25  ;;  %3803 = vmatprep.subr.bf16.mxu0 %v5606_v26  ;;  %v5673_v25 = vld [vmem:[#allocation7 + $0x188] ss:$16 sps:$4 sm:$0xff]   ;;  %v5678_v26 = vld [vmem:[#allocation7 + $0x564] ss:$16 sps:$4 sm:$0xff]  }
 0x1d9   :  { %3846 = vmatprep.subr.bf16.mxu1 %v5609_v27  ;;  %v5681_v27 = vld [vmem:[#allocation7 + $0x16c] ss:$16 sps:$4 sm:$0xff]  }
 0x1da   :  { %3750 = vmatmul.mubr.bf16.vlgmr.msra.gmra.mxu0 %v6120_v28 }
 0x1db   :  { %3793 = vmatmul.mubr.bf16.vlgmr.msra.gmra.mxu1 %v6122_v29  ;;  %3804 = vmatpush1.bf16.msra.mxu0 %v5604_v4  ;;  %v6154_v4 = vpop.f32.mrf.mxu0 }
 0x1dc   :  { %3847 = vmatpush1.bf16.msra.mxu1 %v5607_v31  ;;  %3805 = vmatprep.subr.bf16.mxu0 %v5612_v32  ;;  %v6156_v31 = vpop.f32.mrf.mxu1  ;;  %v5676_v32 = vld [vmem:[#allocation7 + $0x560] ss:$16 sps:$4 sm:$0xff]  }
 0x1dd   :  { %3848 = vmatprep.subr.bf16.mxu1 %v5615_v10  ;;  %3835 = vmatprep.mubr.bf16.mxu0 %v6124_v33  ;;  %v5679_v10 = vld [vmem:[#allocation7 + $0x168] ss:$16 sps:$4 sm:$0xff]  }
 0x1de   :  { %3878 = vmatprep.mubr.bf16.mxu1 %v6113_v49  ;;  %v5631_v49 = vld [vmem:[#allocation7 + $0x68] ss:$16 sps:$4 sm:$0xff]  }
 0x1df   :  { %3806 = vmatpush1.bf16.msra.mxu0 %v5610_v35  ;;  %v5684_v35 = vld [vmem:[#allocation7 + $0x544] ss:$16 sps:$4 sm:$0xff]  }
 0x1e0   :  { %3849 = vmatpush1.bf16.msra.mxu1 %v5613_v34  ;;  %3807 = vmatprep.subr.bf16.mxu0 %v5618_v36  ;;  %v5687_v34 = vld [vmem:[#allocation7 + $0x14c] ss:$16 sps:$4 sm:$0xff]   ;;  %v6158_v36 = vpop.f32.mrf.mxu0 }
 0x1e1   :  { %3850 = vmatprep.subr.bf16.mxu1 %v5621_v16  ;;  %v6160_v16 = vpop.f32.mrf.mxu1 }
 0x1e3   :  { %3808 = vmatpush1.bf16.msra.mxu0 %v5616_v37  ;;  %v5682_v37 = vld [vmem:[#allocation7 + $0x540] ss:$16 sps:$4 sm:$0xff]  }
 0x1e4   :  { %3851 = vmatpush1.bf16.msra.mxu1 %v5619_v38  ;;  %3809 = vmatprep.subr.bf16.mxu0 %v5624_v20  ;;  %v5685_v38 = vld [vmem:[#allocation7 + $0x148] ss:$16 sps:$4 sm:$0xff]   ;;  %v6162_v20 = vpop.f32.mrf.mxu0 }
 0x1e5   :  { %3852 = vmatprep.subr.bf16.mxu1 %v5627_v39  ;;  %v2546_v39 = vpop.f32.mrf.mxu1 }
 0x1e7   :  { %3810 = vmatpush1.bf16.msra.mxu0 %v5622_v40  ;;  %v5690_v40 = vld [vmem:[#allocation7 + $0x524] ss:$16 sps:$4 sm:$0xff]  }
 0x1e8   :  { %3853 = vmatpush1.bf16.msra.mxu1 %v5625_v41  ;;  %3811 = vmatprep.subr.bf16.mxu0 %v5630_v42  ;;  %v5693_v41 = vld [vmem:[#allocation7 + $0x12c] ss:$16 sps:$4 sm:$0xff]   ;;  %v5688_v42 = vld [vmem:[#allocation7 + $0x520] ss:$16 sps:$4 sm:$0xff]  }
 0x1e9   :  { %3854 = vmatprep.subr.bf16.mxu1 %v5633_v43  ;;  %v5691_v43 = vld [vmem:[#allocation7 + $0x128] ss:$16 sps:$4 sm:$0xff]  }
 0x1eb   :  { %3812 = vmatpush1.bf16.msra.mxu0 %v5628_v44  ;;  %v6164_v44 = vpop.f32.mrf.mxu0 }
 0x1ec   :  { %3855 = vmatpush1.bf16.msra.mxu1 %v5631_v49  ;;  %3813 = vmatprep.subr.bf16.mxu0 %v5636_v45  ;;  %v2548_v49 = vpop.f32.mrf.mxu1  ;;  %v5696_v45 = vld [vmem:[#allocation7 + $0x504] ss:$16 sps:$4 sm:$0xff]  }
 0x1ed   :  { %3856 = vmatprep.subr.bf16.mxu1 %v5639_v46  ;;  %v5699_v46 = vld [vmem:[#allocation7 + $0x10c] ss:$16 sps:$4 sm:$0xff]  }
 0x1ef   :  { %3814 = vmatpush1.bf16.msra.mxu0 %v5634_v47  ;;  %v5694_v47 = vld [vmem:[#allocation7 + $0x500] ss:$16 sps:$4 sm:$0xff]  }
 0x1f0   :  { %3857 = vmatpush1.bf16.msra.mxu1 %v5637_v48  ;;  %3815 = vmatprep.subr.bf16.mxu0 %v5642_v50  ;;  %v5697_v48 = vld [vmem:[#allocation7 + $0x108] ss:$16 sps:$4 sm:$0xff]   ;;  %v6166_v50 = vpop.f32.mrf.mxu0 }
 0x1f1   :  { %3858 = vmatprep.subr.bf16.mxu1 %v5645_v51  ;;  %v2550_v51 = vpop.f32.mrf.mxu1 }
 0x1f3   :  { %3816 = vmatpush1.bf16.msra.mxu0 %v5640_v52  ;;  %v5705_v52 = vld [vmem:[#allocation7 + $0x2ec] ss:$16 sps:$4 sm:$0xff]  }
 0x1f4   :  { %3859 = vmatpush1.bf16.msra.mxu1 %v5643_v53  ;;  %3817 = vmatprep.subr.bf16.mxu0 %v5648_v56  ;;  %v5708_v53 = vld [vmem:[#allocation7 + $0x4ec] ss:$16 sps:$4 sm:$0xff]   ;;  %v6168_v56 = vld [vmem:[#allocation2 + $0x10] ss:$24 sps:$4 sm:$0xff]  }
 0x1f5   :  { %3860 = vmatprep.subr.bf16.mxu1 %v5651_v57  ;;  %v5703_v57 = vld [vmem:[#allocation7 + $0x2e8] ss:$16 sps:$4 sm:$0xff]  }
 0x1f7   :  { %3818 = vmatpush1.bf16.msra.mxu0 %v5646_v58  ;;  %v5706_v58 = vld [vmem:[#allocation7 + $0x4e8] ss:$16 sps:$4 sm:$0xff]  }
 0x1f8   :  { %3861 = vmatpush1.bf16.msra.mxu1 %v5649_v59  ;;  %3819 = vmatprep.subr.bf16.mxu0 %v5654_v62  ;;  %v6170_v59 = vpop.f32.mrf.mxu0  ;;  %v2552_v62 = vpop.f32.mrf.mxu1 }
 0x1f9   :  { %3862 = vmatprep.subr.bf16.mxu1 %v5657_v63  ;;  %v5711_v63 = vld [vmem:[#allocation7 + $0x2cc] ss:$16 sps:$4 sm:$0xff]  }
 0x1fb   :  { %3820 = vmatpush2.bf16.msra.mxu0 %v5652_v0  ;;  %v5714_v0 = vld [vmem:[#allocation7 + $0x4cc] ss:$16 sps:$4 sm:$0xff]  }
 0x1fc   :  { %3863 = vmatpush2.bf16.msra.mxu1 %v5655_v1  ;;  %3821 = vmatprep.subr.bf16.mxu0 %v5660_v5 }
 0x1fd   :  { %3864 = vmatprep.subr.bf16.mxu1 %v5663_v6 }
 0x1ff   :  { %3822 = vmatpush2.bf16.msra.mxu0 %v5658_v7  ;;  %v5709_v7 = vld [vmem:[#allocation7 + $0x2c8] ss:$16 sps:$4 sm:$0xff]  }
 0x200   :  { %3865 = vmatpush2.bf16.msra.mxu1 %v5661_v8  ;;  %3823 = vmatprep.subr.bf16.mxu0 %v5666_v12  ;;  %v5712_v8 = vld [vmem:[#allocation7 + $0x4c8] ss:$16 sps:$4 sm:$0xff]  }
 0x201   :  { %3866 = vmatprep.subr.bf16.mxu1 %v5669_v13 }
 0x203   :  { %3824 = vmatpush2.bf16.msra.mxu0 %v5664_v17  ;;  %v5717_v17 = vld [vmem:[#allocation7 + $0x2ac] ss:$16 sps:$4 sm:$0xff]  }
 0x204   :  { %3867 = vmatpush2.bf16.msra.mxu1 %v5667_v18  ;;  %3825 = vmatprep.subr.bf16.mxu0 %v5672_v19  ;;  %v5720_v18 = vld [vmem:[#allocation7 + $0x4ac] ss:$16 sps:$4 sm:$0xff]  }
 0x205   :  { %3868 = vmatprep.subr.bf16.mxu1 %v5675_v21 }
 0x207   :  { %3826 = vmatpush2.bf16.msra.mxu0 %v5670_v24 }
 0x208   :  { %3869 = vmatpush2.bf16.msra.mxu1 %v5673_v25  ;;  %3827 = vmatprep.subr.bf16.mxu0 %v5678_v26 }
 0x209   :  { %3870 = vmatprep.subr.bf16.mxu1 %v5681_v27  ;;  %v5715_v27 = vld [vmem:[#allocation7 + $0x2a8] ss:$16 sps:$4 sm:$0xff]  }
 0x20b   :  { %3828 = vmatpush2.bf16.msra.mxu0 %v5676_v32  ;;  %v5718_v32 = vld [vmem:[#allocation7 + $0x4a8] ss:$16 sps:$4 sm:$0xff]  }
 0x20c   :  { %3871 = vmatpush2.bf16.msra.mxu1 %v5679_v10  ;;  %3829 = vmatprep.subr.bf16.mxu0 %v5684_v35  ;;  %v5723_v35 = vld [vmem:[#allocation7 + $0x28c] ss:$16 sps:$4 sm:$0xff]  }
 0x20d   :  { %3872 = vmatprep.subr.bf16.mxu1 %v5687_v34  ;;  %v5726_v34 = vld [vmem:[#allocation7 + $0x48c] ss:$16 sps:$4 sm:$0xff]  }
 0x20f   :  { %3830 = vmatpush2.bf16.msra.mxu0 %v5682_v37 }
 0x210   :  { %3873 = vmatpush2.bf16.msra.mxu1 %v5685_v38  ;;  %3831 = vmatprep.subr.bf16.mxu0 %v5690_v40  ;;  %v5724_v40 = vld [vmem:[#allocation7 + $0x488] ss:$16 sps:$4 sm:$0xff]  }
 0x211   :  { %3874 = vmatprep.subr.bf16.mxu1 %v5693_v41  ;;  %v5729_v41 = vld [vmem:[#allocation7 + $0x26c] ss:$16 sps:$4 sm:$0xff]  }
 0x213   :  { %3832 = vmatpush2.bf16.msra.mxu0 %v5688_v42  ;;  %v5732_v42 = vld [vmem:[#allocation7 + $0x46c] ss:$16 sps:$4 sm:$0xff]  }
 0x214   :  { %3875 = vmatpush2.bf16.msra.mxu1 %v5691_v43  ;;  %3833 = vmatprep.subr.bf16.mxu0 %v5696_v45  ;;  %v5727_v43 = vld [vmem:[#allocation7 + $0x268] ss:$16 sps:$4 sm:$0xff]   ;;  %v5735_v45 = vld [vmem:[#allocation7 + $0x24c] ss:$16 sps:$4 sm:$0xff]  }
 0x215   :  { %3876 = vmatprep.subr.bf16.mxu1 %v5699_v46  ;;  %v5738_v46 = vld [vmem:[#allocation7 + $0x44c] ss:$16 sps:$4 sm:$0xff]  }
 0x217   :  { %3834 = vmatpush2.bf16.msra.mxu0 %v5694_v47  ;;  %v5733_v47 = vld [vmem:[#allocation7 + $0x248] ss:$16 sps:$4 sm:$0xff]  }
 0x218   :  { %3877 = vmatpush2.bf16.msra.mxu1 %v5697_v48  ;;  %3889 = vmatprep.subr.bf16.mxu0 %v5705_v52  ;;  %v5736_v48 = vld [vmem:[#allocation7 + $0x448] ss:$16 sps:$4 sm:$0xff]   ;;  %v5744_v52 = vld [vmem:[#allocation7 + $0x42c] ss:$16 sps:$4 sm:$0xff]  }
 0x219   :  { %3932 = vmatprep.subr.bf16.mxu1 %v5708_v53  ;;  %v5739_v53 = vld [vmem:[#allocation7 + $0x228] ss:$16 sps:$4 sm:$0xff]  }
 0x21a   :  { %v2589_v1 = vpop.f32.mrf.mxu0  ;;  %3836 = vmatmul.mubr.bf16.vlgmr.msra.gmra.mxu0 %v6168_v56 }
 0x21b   :  { %v2632_v5 = vpop.f32.mrf.mxu1  ;;  %3879 = vmatmul.mubr.bf16.vlgmr.msra.gmra.mxu1 %v6120_v28  ;;  %v2590_v6 = vadd.f32 %v2589_v1, %v2546_v39  ;;  %3890 = vmatpush1.bf16.msra.mxu0 %v5703_v57  ;;  %v5742_v57 = vld [vmem:[#allocation7 + $0x428] ss:$16 sps:$4 sm:$0xff]   ;;  %v5753_v1 = vld [vmem:[#allocation7 + $0x3ec] ss:$16 sps:$4 sm:$0xff]  }
 0x21c   :  { %3933 = vmatpush1.bf16.msra.mxu1 %v5706_v58  ;;  %v2591_v12 = vpop.f32.mrf.mxu0  ;;  %3891 = vmatprep.subr.bf16.mxu0 %v5711_v63  ;;  %v5747_v58 = vld [vmem:[#allocation7 + $0x20c] ss:$16 sps:$4 sm:$0xff]   ;;  %v5745_v63 = vld [vmem:[#allocation7 + $0x208] ss:$16 sps:$4 sm:$0xff]  }
 0x21d   :  { %v2634_v13 = vpop.f32.mrf.mxu1  ;;  %3934 = vmatprep.subr.bf16.mxu1 %v5714_v0  ;;  %v6174_v19 = vadd.f32 %v2632_v5, %v2590_v6  ;;  %v2592_v21 = vadd.f32 %v2591_v12, %v2548_v49  ;;  %3921 = vmatprep.mubr.bf16.mxu0 %v6115_v30  ;;  %v5730_v49 = vld [vmem:[#allocation7 + $0x468] ss:$16 sps:$4 sm:$0xff]   ;;  %v5756_v5 = vld [vmem:[#allocation7 + $0x5ec] ss:$16 sps:$4 sm:$0xff]  }
 0x21e   :  { %3964 = vmatprep.mubr.bf16.mxu1 %v6124_v33  ;;  %v2593_v24 = vpop.f32.mrf.mxu0  ;;  %v5721_v33 = vld [vmem:[#allocation7 + $0x288] ss:$16 sps:$4 sm:$0xff]   ;;  %v5762_v12 = vld [vmem:[#allocation7 + $0x5cc] ss:$16 sps:$4 sm:$0xff]  }
 0x21f   :  { %v2636_v28 = vpop.f32.mrf.mxu1  ;;  %v6178_v25 = vadd.f32 %v2634_v13, %v2592_v21  ;;  %v2594_v26 = vadd.f32 %v2593_v24, %v2550_v51  ;;  %3892 = vmatpush1.bf16.msra.mxu0 %v5709_v7  ;;  %v5741_v51 = vld [vmem:[#allocation7 + $0x22c] ss:$16 sps:$4 sm:$0xff]   ;;  %v5748_v0 = vld [vmem:[#allocation7 + $0x408] ss:$16 sps:$4 sm:$0xff]  }
 0x220   :  { %3935 = vmatpush1.bf16.msra.mxu1 %v5712_v8  ;;  %v2595_v10 = vpop.f32.mrf.mxu0  ;;  %3893 = vmatprep.subr.bf16.mxu0 %v5717_v17  ;;  %v5751_v6 = vld [vmem:[#allocation7 + $0x3e8] ss:$16 sps:$4 sm:$0xff]   ;;  %v5759_v8 = vld [vmem:[#allocation7 + $0x3cc] ss:$16 sps:$4 sm:$0xff]  }
 0x221   :  { %3936 = vmatprep.subr.bf16.mxu1 %v5720_v18  ;;  %v6180_v37 = vadd.f32 %v2636_v28, %v2594_v26  ;;  %v2596_v38 = vadd.f32 %v2595_v10, %v2552_v62  ;;  %v2638_v30 = vpop.f32.mrf.mxu1  ;;  %v5750_v62 = vld [vmem:[#allocation7 + $0x40c] ss:$16 sps:$4 sm:$0xff]   ;;  %v5754_v7 = vld [vmem:[#allocation7 + $0x5e8] ss:$16 sps:$4 sm:$0xff]  }
 0x222   :  { %v5757_v13 = vld [vmem:[#allocation7 + $0x3c8] ss:$16 sps:$4 sm:$0xff]   ;;  %v5765_v18 = vld [vmem:[#allocation7 + $0x3ac] ss:$16 sps:$4 sm:$0xff]  }
 0x223   :  { %v6182_v39 = vadd.f32 %v2638_v30, %v2596_v38  ;;  %3894 = vmatpush1.bf16.msra.mxu0 %v5715_v27  ;;  %v5760_v17 = vld [vmem:[#allocation7 + $0x5c8] ss:$16 sps:$4 sm:$0xff]   ;;  %v5768_v21 = vld [vmem:[#allocation7 + $0x5ac] ss:$16 sps:$4 sm:$0xff]  }
 0x224   :  { %3937 = vmatpush1.bf16.msra.mxu1 %v5718_v32  ;;  %3895 = vmatprep.subr.bf16.mxu0 %v5723_v35  ;;  %v5763_v24 = vld [vmem:[#allocation7 + $0x3a8] ss:$16 sps:$4 sm:$0xff]   ;;  %v5771_v26 = vld [vmem:[#allocation7 + $0x38c] ss:$16 sps:$4 sm:$0xff]  }
 0x225   :  { %3938 = vmatprep.subr.bf16.mxu1 %v5726_v34  ;;  %v5766_v28 = vld [vmem:[#allocation7 + $0x5a8] ss:$16 sps:$4 sm:$0xff]   ;;  %v5774_v27 = vld [vmem:[#allocation7 + $0x58c] ss:$16 sps:$4 sm:$0xff]  }
 0x226   :  { %v5769_v32 = vld [vmem:[#allocation7 + $0x388] ss:$16 sps:$4 sm:$0xff]   ;;  %v5777_v35 = vld [vmem:[#allocation7 + $0x36c] ss:$16 sps:$4 sm:$0xff]  }
 0x227   :  { %3896 = vmatpush1.bf16.msra.mxu0 %v5721_v33  ;;  %v5772_v10 = vld [vmem:[#allocation7 + $0x588] ss:$16 sps:$4 sm:$0xff]   ;;  %v5780_v34 = vld [vmem:[#allocation7 + $0x56c] ss:$16 sps:$4 sm:$0xff]  }
 0x228   :  { %3939 = vmatpush1.bf16.msra.mxu1 %v5724_v40  ;;  %3897 = vmatprep.subr.bf16.mxu0 %v5729_v41  ;;  %v5775_v38 = vld [vmem:[#allocation7 + $0x368] ss:$16 sps:$4 sm:$0xff]   ;;  %v5783_v33 = vld [vmem:[#allocation7 + $0x34c] ss:$16 sps:$4 sm:$0xff]  }
 0x229   :  { %3940 = vmatprep.subr.bf16.mxu1 %v5732_v42  ;;  %v5778_v30 = vld [vmem:[#allocation7 + $0x568] ss:$16 sps:$4 sm:$0xff]   ;;  %v5786_v40 = vld [vmem:[#allocation7 + $0x54c] ss:$16 sps:$4 sm:$0xff]  }
 0x22a   :  { %v5781_v41 = vld [vmem:[#allocation7 + $0x348] ss:$16 sps:$4 sm:$0xff]  }
 0x22b   :  { %3898 = vmatpush1.bf16.msra.mxu0 %v5727_v43  ;;  %v5784_v42 = vld [vmem:[#allocation7 + $0x548] ss:$16 sps:$4 sm:$0xff]   ;;  %v5789_v43 = vld [vmem:[#allocation7 + $0x32c] ss:$16 sps:$4 sm:$0xff]  }
 0x22c   :  { %3941 = vmatpush1.bf16.msra.mxu1 %v5730_v49  ;;  %3899 = vmatprep.subr.bf16.mxu0 %v5735_v45  ;;  %v5792_v49 = vld [vmem:[#allocation7 + $0x52c] ss:$16 sps:$4 sm:$0xff]   ;;  %v5787_v45 = vld [vmem:[#allocation7 + $0x328] ss:$16 sps:$4 sm:$0xff]  }
 0x22d   :  { %3942 = vmatprep.subr.bf16.mxu1 %v5738_v46  ;;  %v5790_v46 = vld [vmem:[#allocation7 + $0x528] ss:$16 sps:$4 sm:$0xff]  }
 0x22f   :  { %3900 = vmatpush1.bf16.msra.mxu0 %v5733_v47  ;;  %v5795_v47 = vld [vmem:[#allocation7 + $0x30c] ss:$16 sps:$4 sm:$0xff]  }
 0x230   :  { %3943 = vmatpush1.bf16.msra.mxu1 %v5736_v48  ;;  %3901 = vmatprep.subr.bf16.mxu0 %v5741_v51  ;;  %v5798_v48 = vld [vmem:[#allocation7 + $0x50c] ss:$16 sps:$4 sm:$0xff]   ;;  %v5793_v51 = vld [vmem:[#allocation7 + $0x308] ss:$16 sps:$4 sm:$0xff]  }
 0x231   :  { %3944 = vmatprep.subr.bf16.mxu1 %v5744_v52  ;;  %v5796_v52 = vld [vmem:[#allocation7 + $0x508] ss:$16 sps:$4 sm:$0xff]  }
 0x233   :  { %3902 = vmatpush1.bf16.msra.mxu0 %v5739_v53  ;;  %v5799_v53 = vld [vmem:[#allocation11 + $0x78] sm:$0xff]  }
 0x234   :  { %3945 = vmatpush1.bf16.msra.mxu1 %v5742_v57  ;;  %3903 = vmatprep.subr.bf16.mxu0 %v5747_v58  ;;  %v5800_v57 = vld [vmem:[#allocation11 + $0x38] sm:$0xff]   ;;  %v5801_v58 = vld [vmem:[#allocation11 + $0x70] sm:$0xff]  }
 0x235   :  { %3946 = vmatprep.subr.bf16.mxu1 %v5750_v62 }
 0x237   :  { %3904 = vmatpush1.bf16.msra.mxu0 %v5745_v63 }
 0x238   :  { %3947 = vmatpush1.bf16.msra.mxu1 %v5748_v0  ;;  %3905 = vmatprep.subr.bf16.mxu0 %v5753_v1  ;;  %v5802_v1 = vld [vmem:[#allocation11 + $0x30] sm:$0xff]  }
 0x239   :  { %3948 = vmatprep.subr.bf16.mxu1 %v5756_v5 }
 0x23b   :  { %3906 = vmatpush2.bf16.msra.mxu0 %v5751_v6 }
 0x23c   :  { %3949 = vmatpush2.bf16.msra.mxu1 %v5754_v7  ;;  %3907 = vmatprep.subr.bf16.mxu0 %v5759_v8  ;;  %v5803_v7 = vld [vmem:[#allocation11 + $0x68] sm:$0xff]  }
 0x23d   :  { %3950 = vmatprep.subr.bf16.mxu1 %v5762_v12 }
 0x23f   :  { %3908 = vmatpush2.bf16.msra.mxu0 %v5757_v13 }
 0x240   :  { %3951 = vmatpush2.bf16.msra.mxu1 %v5760_v17  ;;  %3909 = vmatprep.subr.bf16.mxu0 %v5765_v18 }
 0x241   :  { %3952 = vmatprep.subr.bf16.mxu1 %v5768_v21 }
 0x243   :  { %3910 = vmatpush2.bf16.msra.mxu0 %v5763_v24 }
 0x244   :  { %3953 = vmatpush2.bf16.msra.mxu1 %v5766_v28  ;;  %3911 = vmatprep.subr.bf16.mxu0 %v5771_v26 }
 0x245   :  { %3954 = vmatprep.subr.bf16.mxu1 %v5774_v27 }
 0x247   :  { %3912 = vmatpush2.bf16.msra.mxu0 %v5769_v32  ;;  %v5807_v32 = vld [vmem:[#allocation11 + $0x58] sm:$0xff]  }
 0x248   :  { %3955 = vmatpush2.bf16.msra.mxu1 %v5772_v10  ;;  %3913 = vmatprep.subr.bf16.mxu0 %v5777_v35  ;;  %v5808_v10 = vld [vmem:[#allocation11 + $0x18] sm:$0xff]  }
 0x249   :  { %3956 = vmatprep.subr.bf16.mxu1 %v5780_v34  ;;  %v5815_v35 = vld [vmem:[#allocation11 + $0xf8] sm:$0xff]  }
 0x24a   :  { %v5816_v34 = vld [vmem:[#allocation11 + $0xb8] sm:$0xff]  }
 0x24b   :  { %3914 = vmatpush2.bf16.msra.mxu0 %v5775_v38  ;;  %v5817_v38 = vld [vmem:[#allocation11 + $0xf0] sm:$0xff]  }
 0x24c   :  { %3957 = vmatpush2.bf16.msra.mxu1 %v5778_v30  ;;  %3915 = vmatprep.subr.bf16.mxu0 %v5783_v33  ;;  %v5810_v30 = vld [vmem:[#allocation11 + $0x10] sm:$0xff]   ;;  %v5811_v33 = vld [vmem:[#allocation11 + $0x48] sm:$0xff]  }
 0x24d   :  { %3958 = vmatprep.subr.bf16.mxu1 %v5786_v40  ;;  %v5819_v40 = vld [vmem:[#allocation11 + $0xe8] sm:$0xff]  }
 0x24f   :  { %3916 = vmatpush2.bf16.msra.mxu0 %v5781_v41  ;;  %v5812_v41 = vld [vmem:[#allocation11 + $0x8] sm:$0xff]  }
 0x250   :  { %3959 = vmatpush2.bf16.msra.mxu1 %v5784_v42  ;;  %3917 = vmatprep.subr.bf16.mxu0 %v5789_v43  ;;  %v5813_v42 = vld [vmem:[#allocation11 + $0x40] sm:$0xff]   ;;  %v5820_v43 = vld [vmem:[#allocation11 + $0xa8] sm:$0xff]  }
 0x251   :  { %3960 = vmatprep.subr.bf16.mxu1 %v5792_v49  ;;  %v5821_v49 = vld [vmem:[#allocation11 + $0xe0] sm:$0xff]  }
 0x253   :  { %3918 = vmatpush2.bf16.msra.mxu0 %v5787_v45  ;;  %v5814_v45 = vld [vmem:[#allocation11] sm:$0xff]  }
 0x254   :  { %3961 = vmatpush2.bf16.msra.mxu1 %v5790_v46  ;;  %3919 = vmatprep.subr.bf16.mxu0 %v5795_v47  ;;  %v5822_v46 = vld [vmem:[#allocation11 + $0xa0] sm:$0xff]   ;;  %v5823_v47 = vld [vmem:[#allocation11 + $0xd8] sm:$0xff]  }
 0x255   :  { %3962 = vmatprep.subr.bf16.mxu1 %v5798_v48  ;;  %v5824_v48 = vld [vmem:[#allocation11 + $0x98] sm:$0xff]  }
 0x257   :  { %3920 = vmatpush2.bf16.msra.mxu0 %v5793_v51  ;;  %v5825_v51 = vld [vmem:[#allocation11 + $0xd0] sm:$0xff]  }
 0x258   :  { %3963 = vmatpush2.bf16.msra.mxu1 %v5796_v52  ;;  %4945 = vmatprep.subr.bf16.mxu0 %v5799_v53  ;;  %v5826_v52 = vld [vmem:[#allocation11 + $0x90] sm:$0xff]   ;;  %v5827_v53 = vld [vmem:[#allocation11 + $0xc8] sm:$0xff]  }
 0x259   :  { %4967 = vmatprep.subr.bf16.mxu1 %v5815_v35 }
 0x25a   :  { %v2675_v62 = vpop.f32.mrf.mxu0  ;;  %3922 = vmatmul.mubr.bf16.vlgmr.msra.gmra.mxu0 %v6122_v29 }
 0x25b   :  { %v2718_v63 = vpop.f32.mrf.mxu1  ;;  %3965 = vmatmul.mubr.bf16.vlgmr.msra.gmra.mxu1 %v6168_v56  ;;  %v2676_v0 = vadd.f32 %v2675_v62, %v6174_v19  ;;  %4946 = vmatpush3.bf16.msra.mxu0 %v5800_v57  ;;  %v5804_v56 = vld [vmem:[#allocation11 + $0x28] sm:$0xff]   ;;  %v5805_v19 = vld [vmem:[#allocation11 + $0x60] sm:$0xff]  }
 0x25c   :  { %v2677_v5 = vpop.f32.mrf.mxu0  ;;  %4947 = vmatprep.subr.bf16.mxu0 %v5801_v58  ;;  %4968 = vmatpush3.bf16.msra.mxu1 %v5816_v34  ;;  %v5828_v57 = vld [vmem:[#allocation11 + $0x88] sm:$0xff]   ;;  %v5829_v58 = vld [vmem:[#allocation11 + $0xc0] sm:$0xff]  }
 0x25d   :  { %v2720_v6 = vpop.f32.mrf.mxu1  ;;  %v6187_v8 = vadd.f32 %v2718_v63, %v2676_v0  ;;  %v2678_v12 = vadd.f32 %v2677_v5, %v6178_v25  ;;  %v5806_v25 = vld [vmem:[#allocation11 + $0x20] sm:$0xff]   ;;  %4969 = vmatprep.subr.bf16.mxu1 %v5817_v38  ;;  %v2377_v0 = vadd.f32 %v6136_v61, %v6134_v60  ;;  %v2379_v5 = vadd.f32 %v6140_v3, %v6138_v2 }
 0x25e   :  { %v2679_v13 = vpop.f32.mrf.mxu0  ;;  %v5830_v62 = vld [vmem:[#allocation11 + $0x80] sm:$0xff]  }
 0x25f   :  { %v2722_v17 = vpop.f32.mrf.mxu1  ;;  %v6190_v18 = vadd.f32 %v2720_v6, %v2678_v12  ;;  %v2680_v29 = vadd.f32 %v2679_v13, %v6180_v37  ;;  %4948 = vmatpush3.bf16.msra.mxu0 %v5802_v1  ;;  %v5809_v37 = vld [vmem:[#allocation11 + $0x50] sm:$0xff]   ;;  %v2375_v1 = vadd.f32 %v6132_v55, %v6130_v54  ;;  %v2420_v6 = vadd.f32 %v6150_v22, %v2377_v0 }
 0x260   :  { %v2681_v21 = vpop.f32.mrf.mxu0  ;;  %4949 = vmatprep.subr.bf16.mxu0 %v5803_v7  ;;  %v2381_v13 = vadd.f32 %v6144_v11, %v6142_v9 }
 0x261   :  { %v6193_v24 = vadd.f32 %v2722_v17, %v2680_v29  ;;  %v2682_v28 = vadd.f32 %v2681_v21, %v6182_v39  ;;  %v2724_v26 = vpop.f32.mrf.mxu1  ;;  %v5818_v39 = vld [vmem:[#allocation11 + $0xb0] sm:$0xff]   ;;  %v2418_v7 = vadd.f32 %v6146_v14, %v2375_v1  ;;  %v2422_v17 = vadd.f32 %v6154_v4, %v2379_v5 }
 0x262   :  { %4970 = vmatpush3.bf16.msra.mxu1 %v5818_v39  ;;  %v2463_v60 = vadd.f32 %v6152_v23, %v2420_v6  ;;  %v2424_v61 = vadd.f32 %v6158_v36, %v2381_v13 }
 0x263   :  { %v6196_v27 = vadd.f32 %v2724_v26, %v2682_v28  ;;  %4950 = vmatpush3.bf16.msra.mxu0 %v5804_v56  ;;  %4971 = vmatprep.subr.bf16.mxu1 %v5819_v40  ;;  %v3977_v56 = vlaneseq  ;;  %v2461_v54 = vadd.f32 %v6148_v15, %v2418_v7  ;;  %v2465_v2 = vadd.f32 %v6156_v31, %v2422_v17 }
 0x264   :  { %4951 = vmatprep.subr.bf16.mxu0 %v5805_v19  ;;  %v2506_v3 = vadd.f32 %v6164_v44, %v2463_v60  ;;  %v2467_v9 = vadd.f32 %v6160_v16, %v2424_v61 }
 0x265   :  { %v2504_v14 = vadd.f32 %v6162_v20, %v2461_v54  ;;  %v3978_v21 = vshrl.u32 %v3977_v56, 7  ;;  %v2508_v11 = vadd.f32 %v6166_v50, %v2465_v2 }
 0x266   :  { %4972 = vmatpush3.bf16.msra.mxu1 %v5820_v43  ;;  %v2510_v36 = vadd.f32 %v6170_v59, %v2467_v9 }
 0x267   :  { %4952 = vmatpush3.bf16.msra.mxu0 %v5806_v25  ;;  %4973 = vmatprep.subr.bf16.mxu1 %v5821_v49  ;;  %v3983_v15 = vsub.s32 1, %v3978_v21  ;;  %v3979_v31 = vsub.s32 0, %v3978_v21  ;;  %v3987_v1 = vsub.s32 2, %v3978_v21  ;;  %v3991_v13 = vsub.s32 3, %v3978_v21 }
 0x268   :  { %4953 = vmatprep.subr.bf16.mxu0 %v5807_v32 }
 0x26a   :  { %4974 = vmatpush3.bf16.msra.mxu1 %v5822_v46 }
 0x26b   :  { %4954 = vmatpush3.bf16.msra.mxu0 %v5808_v10  ;;  %4975 = vmatprep.subr.bf16.mxu1 %v5823_v47  ;;  %v3975_v10 = vld [vmem:[#allocation10] sm:$0xf] }
 0x26c   :  { %4955 = vmatprep.subr.bf16.mxu0 %v5809_v37  ;;  %v3984_v16 = vrot.slane %v3975_v10, %v3983_v15  ;;  %v3988_v61 = vrot.slane %v3975_v10, %v3987_v1 }
 0x26e   :  { %4976 = vmatpush3.bf16.msra.mxu1 %v5824_v48 }
 0x26f   :  { %4956 = vmatpush3.bf16.msra.mxu0 %v5810_v30  ;;  %4977 = vmatprep.subr.bf16.mxu1 %v5825_v51  ;;  %v3980_v30 = vrot.slane %v3975_v10, %v3979_v31 }
 0x270   :  { %4957 = vmatprep.subr.bf16.mxu0 %v5811_v33 }
 0x272   :  { %4978 = vmatpush3.bf16.msra.mxu1 %v5826_v52 }
 0x273   :  { %4958 = vmatpush3.bf16.msra.mxu0 %v5812_v41  ;;  %4979 = vmatprep.subr.bf16.mxu1 %v5827_v53 }
 0x274   :  { %4959 = vmatprep.subr.bf16.mxu0 %v5813_v42 }
 0x276   :  { %4980 = vmatpush3.bf16.msra.mxu1 %v5828_v57 }
 0x277   :  { %4960 = vmatpush3.bf16.msra.mxu0 %v5814_v45  ;;  %4981 = vmatprep.subr.bf16.mxu1 %v5829_v58 }
 0x27a   :  { %4982 = vmatpush3.bf16.msra.mxu1 %v5830_v62 }
 0x29a   :  { %v3751_v63 = vpop.f32.mrf.mxu0 }
 0x29b   :  { %v3794_v29 = vpop.f32.mrf.mxu1  ;;  %v3752_v19 = vadd.f32 %v3751_v63, %v2504_v14 }
 0x29c   :  { %v3753_v12 = vpop.f32.mrf.mxu0 }
 0x29d   :  { %v3796_v22 = vpop.f32.mrf.mxu1  ;;  %v3754_v4 = vadd.f32 %v3753_v12, %v2506_v3  ;;  %v3795_v20 = vadd.f32 %v3794_v29, %v3752_v19 }
 0x29e   :  { %v3755_v55 = vpop.f32.mrf.mxu0 }
 0x29f   :  { %v3756_v28 = vadd.f32 %v3755_v55, %v2508_v11  ;;  %v3798_v26 = vpop.f32.mrf.mxu1  ;;  %v3797_v32 = vadd.f32 %v3796_v22, %v3754_v4 }
 0x2a0   :  { %v3757_v23 = vpop.f32.mrf.mxu0 }
 0x2a1   :  { %v3758_v44 = vadd.f32 %v3757_v23, %v2510_v36  ;;  %v3799_v35 = vadd.f32 %v3798_v26, %v3756_v28  ;;  %v3800_v38 = vpop.f32.mrf.mxu1 }
 0x2a3   :  { %v3801_v39 = vadd.f32 %v3800_v38, %v3758_v44 }
 0x2da   :  { %v3837_v25 = vpop.f32.mrf.mxu0 }
 0x2db   :  { %v3838_v50 = vadd.f32 %v3837_v25, %v3795_v20  ;;  %v3880_v57 = vpop.f32.mrf.mxu1 }
 0x2dc   :  { %v3839_v37 = vpop.f32.mrf.mxu0  ;;  %v3881_v0 = vadd.f32 %v3880_v57, %v6187_v8  ;;  %v3992_v8 = vrot.slane %v3975_v10, %v3991_v13 }
 0x2dd   :  { %v3840_v34 = vadd.f32 %v3839_v37, %v3797_v32  ;;  %v3997_v49 = vadd.f32 %v3980_v30, %v3838_v50  ;;  %v3882_v58 = vpop.f32.mrf.mxu1  ;;  %v4912_v37 = vld [vmem:[#allocation13] ss:$0 sm:$0xff] }
 0x2de   :  { %v3841_v33 = vpop.f32.mrf.mxu0  ;;  %v3883_v7 = vadd.f32 %v3882_v58, %v6190_v18 }
 0x2df   :  { %v3842_v40 = vadd.f32 %v3841_v33, %v3799_v35  ;;  %v3998_v41 = vadd.f32 %v3984_v16, %v3840_v34  ;;  %v4005_v51 = vmax.f32 %v3997_v49, 0.0  ;;  %v3884_v62 = vpop.f32.mrf.mxu1 }
 0x2e0   :  { %v3843_v59 = vpop.f32.mrf.mxu0  ;;  %v3885_v56 = vadd.f32 %v3884_v62, %v6193_v24 }
 0x2e1   :  { %v4001_v42 = vadd.f32 %v3980_v30, %v3842_v40  ;;  %v3844_v43 = vadd.f32 %v3843_v59, %v3801_v39  ;;  %v4006_v47 = vmax.f32 %v3998_v41, 0.0  ;;  %v3886_v63 = vpop.f32.mrf.mxu1 }
 0x2e2   :  { %v3887_v3 = vadd.f32 %v3886_v63, %v6196_v27 }
 0x2e3   :  { %v4002_v45 = vadd.f32 %v3984_v16, %v3844_v43  ;;  %v4009_v46 = vmax.f32 %v4001_v42, 0.0 }
 0x2e5   :  { %v4010_v48 = vmax.f32 %v4002_v45, 0.0  ;;  %v4013_v53 = vpack.c.bf16 %v4009_v46, %v4005_v51 }
 0x2e7   :  { %v4014_v52 = vpack.c.bf16 %v4010_v48, %v4006_v47 }
 0x2e9   :  { %4312 = vmatprep.mubr.bf16.mxu0 %v4014_v52 }
 0x2ea   :  { %4313 = vmatmul.mubr.bf16.vlgmr.msra.gmra.mxu0 %v4013_v53 }
 0x31a   :  { %v3923_v5 = vpop.f32.mrf.mxu0 }
 0x31b   :  { %v3966_v6 = vpop.f32.mrf.mxu1  ;;  %v3924_v12 = vadd.f32 %v3923_v5, %v3881_v0 }
 0x31c   :  { %v3925_v17 = vpop.f32.mrf.mxu0 }
 0x31d   :  { %v3968_v29 = vpop.f32.mrf.mxu1  ;;  %v3967_v60 = vadd.f32 %v3966_v6, %v3924_v12  ;;  %v3926_v54 = vadd.f32 %v3925_v17, %v3883_v7 }
 0x31e   :  { %v3927_v55 = vpop.f32.mrf.mxu0 }
 0x31f   :  { %v3970_v2 = vpop.f32.mrf.mxu1  ;;  %v3969_v14 = vadd.f32 %v3968_v29, %v3926_v54  ;;  %v3928_v22 = vadd.f32 %v3927_v55, %v3885_v56  ;;  %v3999_v11 = vadd.f32 %v3988_v61, %v3967_v60 }
 0x320   :  { %v3929_v9 = vpop.f32.mrf.mxu0 }
 0x321   :  { %v3971_v4 = vadd.f32 %v3970_v2, %v3928_v22  ;;  %v3930_v18 = vadd.f32 %v3929_v9, %v3887_v3  ;;  %v3972_v19 = vpop.f32.mrf.mxu1  ;;  %v4000_v21 = vadd.f32 %v3992_v8, %v3969_v14  ;;  %v4007_v28 = vmax.f32 %v3999_v11, 0.0 }
 0x323   :  { %v4003_v23 = vadd.f32 %v3988_v61, %v3971_v4  ;;  %v3973_v36 = vadd.f32 %v3972_v19, %v3930_v18  ;;  %v4008_v26 = vmax.f32 %v4000_v21, 0.0 }
 0x325   :  { %v4011_v24 = vmax.f32 %v4003_v23, 0.0  ;;  %v4004_v15 = vadd.f32 %v3992_v8, %v3973_v36 }
 0x327   :  { %v4015_v25 = vpack.c.bf16 %v4011_v24, %v4007_v28  ;;  %v4012_v31 = vmax.f32 %v4004_v15, 0.0 }
 0x329   :  { %v4016_v32 = vpack.c.bf16 %v4012_v31, %v4008_v26 }
 0x32b   :  { %4353 = vmatprep.mubr.bf16.mxu1 %v4016_v32 }
 0x32c   :  { %4354 = vmatmul.mubr.bf16.vlgmr.msra.gmra.mxu1 %v4015_v25 }
 0x3aa   :  { %v4961_v27 = vpop.f32.mrf.mxu0 }
 0x3ac   :  { %v4962_v44 = vpop.f32.mrf.mxu0 }
 0x3ad   :  { %v4963_v20 = vadd.f32 %v4962_v44, %v4961_v27 }
 0x3ae   :  { %v4964_v10 = vpop.f32.mrf.mxu0 }
 0x3af   :  { %v4315_v38 = vadd.f32 %v4963_v20, %v4912_v37 }
 0x3b0   :  { %v4965_v35 = vpop.f32.mrf.mxu0 }
 0x3b1   :  { %v4966_v50 = vadd.f32 %v4965_v35, %v4964_v10 }
 0x3b3   :  { %v4318_v59 = vadd.f32 %v4966_v50, %v4912_v37 }
 0x3ec   :  { %v4983_v34 = vpop.f32.mrf.mxu1 }
 0x3ee   :  { %v4984_v16 = vpop.f32.mrf.mxu1 }
 0x3ef   :  { %v4985_v30 = vadd.f32 %v4984_v16, %v4983_v34 }
 0x3f0   :  { %v4986_v33 = vpop.f32.mrf.mxu1 }
 0x3f1   :  { %v4356_v39 = vadd.f32 %v4985_v30, %v4315_v38 }
 0x3f2   :  { %v4987_v40 = vpop.f32.mrf.mxu1 }
 0x3f3   :  { %4362 = vst [vmem:[#allocation14] sm:$0xff] %v4356_v39  ;;  %v4988_v41 = vadd.f32 %v4987_v40, %v4986_v33 }
 0x3f5   :  { %v4359_v42 = vadd.f32 %v4988_v41, %v4318_v59 }
 0x3f7   :  { %4363 = vst [vmem:[#allocation14 + $0x8] sm:$0xff] %v4359_v42 }
 0x3f8   :  { %5986 = shalt.err (!%p5983_p11)
}
 0x3f9   :  { %s6021_s17 = smov 128   ;;  %s6022_s18 = smov 8  }
 0x3fa   :  { %4375 = dma.vmem_to_hbm [thread:$0]  %s4370_s6, 256, %s6232_s7, [#allocation4], %s6021_s17, %s6021_s17, %s6022_s18  }
 0x3fb   :  { %6003 = dma.done.wait [#allocation4], 256  }
 0x3fc   :  { %6004 = vsyncadd [#allocation4], 4294967040 }
 0x3fd   :  { %4379 = vsyncpa [#allocation3], 1 }
 0x3fe   :  { %4380 = vsyncpa [#allocation6], 1 }
 0x3ff   :  { %4381 = vsyncpa [#allocation9], 1 }
 0x400   :  { %4382 = vsyncpa [#allocation12], 1 }
 0x401   :  { %4383 = vsyncpa [#allocation4], 1 }

</bundles_post_ra>
